<compile_context>
chip_gen: v7x
topology: tpu7x:2x2x1
jax: 0.10.0
libtpu: 0.0.40
codegen_flags: <defaults>
</compile_context>

<pallas_src>
import functools

import jax
import jax.numpy as jnp
from jax.experimental import pallas as pl
from jax.experimental.pallas import tpu as pltpu

LANES = 128


# ---------------------------------------------------------------------------
# Pallas kernel
# ---------------------------------------------------------------------------
def _gat_layer(x, adj_mask, w_lr, b_lr, att, bias, hidden):
    """One dense GATv2Conv layer (heads=1) with fused Wl||Wr projection."""
    C = hidden
    # Fused source/target projection: one bf16 MXU pass, 128-lane output, f32 accumulate.
    xlr = jnp.dot(x.astype(jnp.bfloat16), w_lr.astype(jnp.bfloat16),
                  preferred_element_type=jnp.float32) + b_lr            # (N, 128)
    xl = xlr[:, 0:C]                                                     # source transform (N, C)
    xr = xlr[:, C:2 * C]                                                 # target transform (N, C)

    # GATv2 scores: e[i, j] = att . leaky_relu(xl[j] + xr[i], 0.2)
    z = xl[None, :, :] + xr[:, None, :]                                  # (N, N, C)
    z = jnp.where(z > 0.0, z, 0.2 * z)                                   # LeakyReLU(0.2)
    scores = jnp.sum(z * att[None, :, :], axis=-1)                       # (N, N)
    scores = jnp.where(adj_mask, scores, jnp.float32(-1e30))

    # Softmax over sources. Every row has a self-loop (caller invariant), so the
    # row max is finite and masked entries underflow to exactly 0 after exp --
    # no explicit re-mask multiply needed.
    m = jnp.max(scores, axis=1, keepdims=True)
    e = jnp.exp(scores - m)
    denom = jnp.sum(e, axis=1, keepdims=True)
    alpha = e * pl.reciprocal(denom, approx=True)                        # EUP reciprocal

    out = jnp.dot(alpha.astype(jnp.bfloat16), xl.astype(jnp.bfloat16),
                  preferred_element_type=jnp.float32) + bias             # (N, C)
    return out


def _simple_gat_kernel(x_ref, adj_ref, pool_ref, wslab_ref, vslab_ref, out_ref,
                       *, f_pad, hidden):
    C = hidden
    x = x_ref[...]
    adj_mask = adj_ref[...] > 0.5
    ws = wslab_ref[...]
    vs = vslab_ref[...]

    # Static slices out of the packed parameter slabs (sublane offsets are 8-aligned).
    w1 = ws[0:f_pad, :]                          # (F_pad, 128)  [Wl | Wr | 0]
    w2 = ws[f_pad:f_pad + C, :]                  # (C, 128)      [Wl | Wr | 0]
    w_out = ws[f_pad + C:f_pad + 2 * C, :]       # (C, 128)      [I  | Wlin | 0]
    b1_lr = vs[0:1, :]                           # (1, 128)      [bl | br | 0]
    b2_lr = vs[1:2, :]
    att1 = vs[2:3, 0:C]
    att2 = vs[3:4, 0:C]
    bias1 = vs[4:5, 0:C]
    bias2 = vs[5:6, 0:C]
    b_out = vs[6:7, :]                           # (1, 128)      [0 | blin | 0]

    h1 = jnp.maximum(_gat_layer(x, adj_mask, w1, b1_lr, att1, bias1, C), 0.0)   # ReLU
    h2 = jnp.maximum(_gat_layer(h1, adj_mask, w2, b2_lr, att2, bias2, C), 0.0)  # ReLU

    # global_mean_pool as a dense matmul.
    feat = jnp.dot(pool_ref[...].astype(jnp.bfloat16), h2.astype(jnp.bfloat16),
                   preferred_element_type=jnp.float32)                           # (B, C)

    # Lane-dense (B, 128) store: feat pass-through (identity block) + Linear, single matmul.
    out_ref[...] = jnp.dot(feat, w_out, preferred_element_type=jnp.float32) + b_out


# ---------------------------------------------------------------------------
# Wrapper: pack parameters into slabs, call the kernel, unpack outputs.
# ---------------------------------------------------------------------------
def simple_gat_forward(x, adj, pool, params):
    (w1l, b1l, w1r, b1r, att1, bias1,
     w2l, b2l, w2r, b2r, att2, bias2,
     wlin, blin) = params

    N, F_in = x.shape
    B = pool.shape[0]
    C = w1l.shape[1]
    out_c = wlin.shape[1]
    assert 2 * C <= LANES and C + out_c <= LANES
    f_pad = ((F_in + 7) // 8) * 8

    def pad_lanes(a):
        return jnp.pad(a, ((0, 0), (0, LANES - a.shape[1])))

    # Weight slab: [ W1_lr ; W2_lr ; W_out ]  -> (f_pad + 2C, 128)
    w1_lr = pad_lanes(jnp.concatenate([w1l, w1r], axis=1))           # (F_in, 128)
    w1_lr = jnp.pad(w1_lr, ((0, f_pad - F_in), (0, 0)))              # (f_pad, 128)
    w2_lr = pad_lanes(jnp.concatenate([w2l, w2r], axis=1))           # (C, 128)
    w_out = jnp.zeros((C, LANES), jnp.float32)
    w_out = w_out.at[:, 0:C].set(jnp.eye(C, dtype=jnp.float32))      # feat pass-through
    w_out = w_out.at[:, C:C + out_c].set(wlin)                       # logits = feat @ wlin
    wslab = jnp.concatenate([w1_lr, w2_lr, w_out], axis=0)

    # Vector slab: 8 rows x 128 lanes of biases / attention vectors.
    b_out = jnp.zeros((1, LANES), jnp.float32).at[:, C:C + out_c].set(blin)
    vslab = jnp.concatenate([
        pad_lanes(jnp.concatenate([b1l, b1r], axis=1)),
        pad_lanes(jnp.concatenate([b2l, b2r], axis=1)),
        pad_lanes(att1), pad_lanes(att2),
        pad_lanes(bias1), pad_lanes(bias2),
        b_out,
        jnp.zeros((1, LANES), jnp.float32),
    ], axis=0)                                                       # (8, 128)

    x_pad = jnp.pad(x, ((0, 0), (0, f_pad - F_in)))

    operands = [x_pad, adj, pool, wslab, vslab]
    in_specs = [pl.BlockSpec(a.shape, lambda i, nd=a.ndim: (0,) * nd) for a in operands]
    out_specs = pl.BlockSpec((B, LANES), lambda i: (0, 0))
    out_shape = jax.ShapeDtypeStruct((B, LANES), jnp.float32)

    kernel = functools.partial(_simple_gat_kernel, f_pad=f_pad, hidden=C)
    out = pl.pallas_call(
        kernel,
        grid=(1,),
        in_specs=in_specs,
        out_specs=out_specs,
        out_shape=out_shape,
        compiler_params=pltpu.CompilerParams(dimension_semantics=("arbitrary",)),
    )(*operands)

    feat = out[:, 0:C]
    logits = out[:, C:C + out_c]
    return logits, feat


# ---------------------------------------------------------------------------
# Pure-JAX reference (same math, incl. bf16 MXU inputs) for a correctness check
# ---------------------------------------------------------------------------
def _mxu(a, b):
    return jnp.dot(a.astype(jnp.bfloat16), b.astype(jnp.bfloat16),
                   preferred_element_type=jnp.float32)


def _ref_gat_layer(x, adj, w_l, b_l, w_r, b_r, att, bias):
    C = w_l.shape[1]
    xlr = _mxu(x, jnp.concatenate([w_l, w_r], axis=1)) + jnp.concatenate([b_l, b_r], axis=1)
    xl, xr = xlr[:, :C], xlr[:, C:]
    z = xl[None, :, :] + xr[:, None, :]
    z = jnp.where(z > 0.0, z, 0.2 * z)
    scores = jnp.sum(z * att[None, :, :], axis=-1)
    scores = jnp.where(adj > 0.5, scores, -1e30)
    e = jnp.exp(scores - jnp.max(scores, axis=1, keepdims=True))
    alpha = e / jnp.sum(e, axis=1, keepdims=True)
    return _mxu(alpha, xl) + bias


def simple_gat_reference(x, adj, pool, params):
    (w1l, b1l, w1r, b1r, att1, bias1,
     w2l, b2l, w2r, b2r, att2, bias2,
     wlin, blin) = params
    h1 = jnp.maximum(_ref_gat_layer(x, adj, w1l, b1l, w1r, b1r, att1, bias1), 0.0)
    h2 = jnp.maximum(_ref_gat_layer(h1, adj, w2l, b2l, w2r, b2r, att2, bias2), 0.0)
    feat = _mxu(pool, h2)
    logits = feat @ wlin + blin
    return logits, feat


# ---------------------------------------------------------------------------
# Deterministic parameter init + example graph
# ---------------------------------------------------------------------------
def glorot(key, shape):
    fan_in, fan_out = shape[-2], shape[-1]
    lim = (6.0 / (fan_in + fan_out)) ** 0.5
    return jax.random.uniform(key, shape, jnp.float32, -lim, lim)


def make_params(key, in_channels, hidden, out_channels):
    ks = jax.random.split(key, 8)
    w1l = glorot(ks[0], (in_channels, hidden))
    w1r = glorot(ks[1], (in_channels, hidden))
    att1 = glorot(ks[2], (1, hidden))
    w2l = glorot(ks[3], (hidden, hidden))
    w2r = glorot(ks[4], (hidden, hidden))
    att2 = glorot(ks[5], (1, hidden))
    wlin = glorot(ks[6], (hidden, out_channels))
    zeros = lambda c: jnp.zeros((1, c), jnp.float32)
    b1l, b1r, bias1 = zeros(hidden), zeros(hidden), zeros(hidden)
    b2l, b2r, bias2 = zeros(hidden), zeros(hidden), zeros(hidden)
    blin = 0.01 * glorot(ks[7], (1, out_channels))
    return (w1l, b1l, w1r, b1r, att1, bias1,
            w2l, b2l, w2r, b2r, att2, bias2,
            wlin, blin)


if __name__ == "__main__":
    in_channels = 19
    hidden_channels = 32
    out_channels = 4          # number of clusters / classes
    num_graphs = 2
    nodes_per_graph = 8
    N = num_graphs * nodes_per_graph

    key = jax.random.PRNGKey(0)
    k_x, k_p = jax.random.split(key)

    # Node features
    x = jax.random.normal(k_x, (N, in_channels), jnp.float32)

    # Batch assignment: 8 nodes per graph
    batch = jnp.concatenate([jnp.full((nodes_per_graph,), g, jnp.int32)
                             for g in range(num_graphs)])

    # edge_index: bidirectional ring inside each graph
    src, dst = [], []
    for g in range(num_graphs):
        base = g * nodes_per_graph
        for i in range(nodes_per_graph):
            a, b = base + i, base + (i + 1) % nodes_per_graph
            src += [a, b]
            dst += [b, a]
    src = jnp.asarray(src, jnp.int32)
    dst = jnp.asarray(dst, jnp.int32)

    # Dense adjacency: adj[i, j] = 1 if message flows j -> i; add self-loops (GATv2 default).
    # Self-loops are required: softmax rows must be non-empty.
    adj = jnp.zeros((N, N), jnp.float32).at[dst, src].set(1.0)
    adj = jnp.maximum(adj, jnp.eye(N, dtype=jnp.float32))

    # Mean-pool matrix
    one_hot = (batch[None, :] == jnp.arange(num_graphs)[:, None]).astype(jnp.float32)  # (B, N)
    pool = one_hot / jnp.sum(one_hot, axis=1, keepdims=True)

    params = make_params(k_p, in_channels, hidden_channels, out_channels)

    logits, features = simple_gat_forward(x, adj, pool, params)
    jax.block_until_ready((logits, features))

    ref_logits, ref_features = simple_gat_reference(x, adj, pool, params)
    assert logits.shape == (num_graphs, out_channels)
    assert features.shape == (num_graphs, hidden_channels)
    # Tolerance covers bf16 MXU inputs + approx (EUP) reciprocal in the softmax.
    assert jnp.allclose(logits, ref_logits, rtol=1e-2, atol=1e-2)
    assert jnp.allclose(features, ref_features, rtol=1e-2, atol=1e-2)

    print("KERNEL_OK")
</pallas_src>

<mosaic_0001>
module attributes {stable_mosaic.version = 11 : i64} {
  func.func @_simple_gat_kernel(%arg0: i32, %arg1: memref<16x24xf32, #tpu.memory_space<vmem>>, %arg2: memref<16x16xf32, #tpu.memory_space<vmem>>, %arg3: memref<2x16xf32, #tpu.memory_space<vmem>>, %arg4: memref<88x128xf32, #tpu.memory_space<vmem>>, %arg5: memref<8x128xf32, #tpu.memory_space<vmem>>, %arg6: memref<2x128xf32, #tpu.memory_space<vmem>>) attributes {dimension_semantics = [#tpu.dimension_semantics<arbitrary>], iteration_bounds = array<i64: 1>, scalar_prefetch = 0 : i64, scratch_operands = 0 : i64, tpu.core_type = #tpu.core_type<tc>, window_params = [{pipeline_mode = #tpu.pipeline_mode<synchronous>, transform_indices = @transform_0, window_bounds = array<i64: 16, 24>}, {pipeline_mode = #tpu.pipeline_mode<synchronous>, transform_indices = @transform_1, window_bounds = array<i64: 16, 16>}, {pipeline_mode = #tpu.pipeline_mode<synchronous>, transform_indices = @transform_2, window_bounds = array<i64: 2, 16>}, {pipeline_mode = #tpu.pipeline_mode<synchronous>, transform_indices = @transform_3, window_bounds = array<i64: 88, 128>}, {pipeline_mode = #tpu.pipeline_mode<synchronous>, transform_indices = @transform_4, window_bounds = array<i64: 8, 128>}, {pipeline_mode = #tpu.pipeline_mode<synchronous>, transform_indices = @transform_5, window_bounds = array<i64: 2, 128>}]} {
    %c0 = arith.constant 0 : index
    %c0_0 = arith.constant 0 : index
    %0 = vector.load %arg1[%c0, %c0_0] : memref<16x24xf32, #tpu.memory_space<vmem>>, vector<16x24xf32>
    %c0_1 = arith.constant 0 : index
    %c0_2 = arith.constant 0 : index
    %1 = vector.load %arg2[%c0_1, %c0_2] : memref<16x16xf32, #tpu.memory_space<vmem>>, vector<16x16xf32>
    %cst = arith.constant 5.000000e-01 : f32
    %2 = vector.broadcast %cst : f32 to vector<16x16xf32>
    %3 = arith.cmpf ogt, %1, %2 : vector<16x16xf32>
    %c0_3 = arith.constant 0 : index
    %c0_4 = arith.constant 0 : index
    %4 = vector.load %arg4[%c0_3, %c0_4] : memref<88x128xf32, #tpu.memory_space<vmem>>, vector<88x128xf32>
    %c0_5 = arith.constant 0 : index
    %c0_6 = arith.constant 0 : index
    %5 = vector.load %arg5[%c0_5, %c0_6] : memref<8x128xf32, #tpu.memory_space<vmem>>, vector<8x128xf32>
    %6 = vector.extract_strided_slice %4 {offsets = [0, 0], sizes = [24, 128], strides = [1, 1]} : vector<88x128xf32> to vector<24x128xf32>
    %7 = vector.extract_strided_slice %4 {offsets = [24, 0], sizes = [32, 128], strides = [1, 1]} : vector<88x128xf32> to vector<32x128xf32>
    %8 = vector.extract_strided_slice %4 {offsets = [56, 0], sizes = [32, 128], strides = [1, 1]} : vector<88x128xf32> to vector<32x128xf32>
    %9 = vector.extract_strided_slice %5 {offsets = [0, 0], sizes = [1, 128], strides = [1, 1]} : vector<8x128xf32> to vector<1x128xf32>
    %10 = vector.extract_strided_slice %5 {offsets = [1, 0], sizes = [1, 128], strides = [1, 1]} : vector<8x128xf32> to vector<1x128xf32>
    %11 = vector.extract_strided_slice %5 {offsets = [2, 0], sizes = [1, 32], strides = [1, 1]} : vector<8x128xf32> to vector<1x32xf32>
    %12 = vector.extract_strided_slice %5 {offsets = [3, 0], sizes = [1, 32], strides = [1, 1]} : vector<8x128xf32> to vector<1x32xf32>
    %13 = vector.extract_strided_slice %5 {offsets = [4, 0], sizes = [1, 32], strides = [1, 1]} : vector<8x128xf32> to vector<1x32xf32>
    %14 = vector.extract_strided_slice %5 {offsets = [5, 0], sizes = [1, 32], strides = [1, 1]} : vector<8x128xf32> to vector<1x32xf32>
    %15 = vector.extract_strided_slice %5 {offsets = [6, 0], sizes = [1, 128], strides = [1, 1]} : vector<8x128xf32> to vector<1x128xf32>
    %16 = arith.truncf %0 : vector<16x24xf32> to vector<16x24xbf16>
    %17 = arith.truncf %6 : vector<24x128xf32> to vector<24x128xbf16>
    %cst_7 = arith.constant dense<0.000000e+00> : vector<16x128xf32>
    %18 = tpu.matmul %16, %17, %cst_7 {dimension_numbers = #tpu.dot_dimension_numbers<[1], [0], [0], [1], [0, 0, 1, 1], [], []>} : vector<16x24xbf16>, vector<24x128xbf16>, vector<16x128xf32> -> vector<16x128xf32>
    %19 = vector.broadcast %9 : vector<1x128xf32> to vector<16x128xf32>
    %20 = arith.addf %18, %19 : vector<16x128xf32>
    %21 = vector.extract_strided_slice %20 {offsets = [0, 0], sizes = [16, 32], strides = [1, 1]} : vector<16x128xf32> to vector<16x32xf32>
    %22 = vector.extract_strided_slice %20 {offsets = [0, 32], sizes = [16, 32], strides = [1, 1]} : vector<16x128xf32> to vector<16x32xf32>
    %23 = vector.shape_cast %21 : vector<16x32xf32> to vector<1x16x32xf32>
    %24 = vector.shape_cast %22 : vector<16x32xf32> to vector<16x1x32xf32>
    %25 = vector.broadcast %23 : vector<1x16x32xf32> to vector<16x16x32xf32>
    %26 = vector.broadcast %24 : vector<16x1x32xf32> to vector<16x16x32xf32>
    %27 = arith.addf %25, %26 : vector<16x16x32xf32>
    %cst_8 = arith.constant 0.000000e+00 : f32
    %28 = vector.broadcast %cst_8 : f32 to vector<16x16x32xf32>
    %29 = arith.cmpf ogt, %27, %28 : vector<16x16x32xf32>
    %cst_9 = arith.constant 2.000000e-01 : f32
    %30 = vector.broadcast %cst_9 : f32 to vector<16x16x32xf32>
    %31 = arith.mulf %30, %27 : vector<16x16x32xf32>
    %32 = arith.select %29, %27, %31 : vector<16x16x32xi1>, vector<16x16x32xf32>
    %33 = vector.shape_cast %11 : vector<1x32xf32> to vector<1x1x32xf32>
    %34 = vector.broadcast %33 : vector<1x1x32xf32> to vector<16x16x32xf32>
    %35 = arith.mulf %32, %34 : vector<16x16x32xf32>
    %cst_10 = arith.constant dense<0.000000e+00> : vector<16x16xf32>
    %36 = vector.multi_reduction <add>, %35, %cst_10 [2] : vector<16x16x32xf32> to vector<16x16xf32>
    %cst_11 = arith.constant -1.000000e+30 : f32
    %37 = vector.broadcast %cst_11 : f32 to vector<16x16xf32>
    %38 = arith.select %3, %36, %37 : vector<16x16xi1>, vector<16x16xf32>
    %cst_12 = arith.constant dense<0xFF800000> : vector<16xf32>
    %39 = vector.multi_reduction <maximumf>, %38, %cst_12 [1] : vector<16x16xf32> to vector<16xf32>
    %40 = vector.shape_cast %39 : vector<16xf32> to vector<16x1xf32>
    %41 = vector.broadcast %40 : vector<16x1xf32> to vector<16x16xf32>
    %42 = arith.subf %38, %41 : vector<16x16xf32>
    %43 = math.exp %42 : vector<16x16xf32>
    %cst_13 = arith.constant dense<0.000000e+00> : vector<16xf32>
    %44 = vector.multi_reduction <add>, %43, %cst_13 [1] : vector<16x16xf32> to vector<16xf32>
    %45 = vector.shape_cast %44 : vector<16xf32> to vector<16x1xf32>
    %46 = tpu.reciprocal %45 {approx = true} : vector<16x1xf32> -> vector<16x1xf32>
    %47 = vector.broadcast %46 : vector<16x1xf32> to vector<16x16xf32>
    %48 = arith.mulf %43, %47 : vector<16x16xf32>
    %49 = arith.truncf %48 : vector<16x16xf32> to vector<16x16xbf16>
    %50 = arith.truncf %21 : vector<16x32xf32> to vector<16x32xbf16>
    %cst_14 = arith.constant dense<0.000000e+00> : vector<16x32xf32>
    %51 = tpu.matmul %49, %50, %cst_14 {dimension_numbers = #tpu.dot_dimension_numbers<[1], [0], [0], [1], [0, 0, 1, 1], [], []>} : vector<16x16xbf16>, vector<16x32xbf16>, vector<16x32xf32> -> vector<16x32xf32>
    %52 = vector.broadcast %13 : vector<1x32xf32> to vector<16x32xf32>
    %53 = arith.addf %51, %52 : vector<16x32xf32>
    %cst_15 = arith.constant 0.000000e+00 : f32
    %54 = vector.broadcast %cst_15 : f32 to vector<16x32xf32>
    %55 = arith.maximumf %53, %54 : vector<16x32xf32>
    %56 = arith.truncf %55 : vector<16x32xf32> to vector<16x32xbf16>
    %57 = arith.truncf %7 : vector<32x128xf32> to vector<32x128xbf16>
    %cst_16 = arith.constant dense<0.000000e+00> : vector<16x128xf32>
    %58 = tpu.matmul %56, %57, %cst_16 {dimension_numbers = #tpu.dot_dimension_numbers<[1], [0], [0], [1], [0, 0, 1, 1], [], []>} : vector<16x32xbf16>, vector<32x128xbf16>, vector<16x128xf32> -> vector<16x128xf32>
    %59 = vector.broadcast %10 : vector<1x128xf32> to vector<16x128xf32>
    %60 = arith.addf %58, %59 : vector<16x128xf32>
    %61 = vector.extract_strided_slice %60 {offsets = [0, 0], sizes = [16, 32], strides = [1, 1]} : vector<16x128xf32> to vector<16x32xf32>
    %62 = vector.extract_strided_slice %60 {offsets = [0, 32], sizes = [16, 32], strides = [1, 1]} : vector<16x128xf32> to vector<16x32xf32>
    %63 = vector.shape_cast %61 : vector<16x32xf32> to vector<1x16x32xf32>
    %64 = vector.shape_cast %62 : vector<16x32xf32> to vector<16x1x32xf32>
    %65 = vector.broadcast %63 : vector<1x16x32xf32> to vector<16x16x32xf32>
    %66 = vector.broadcast %64 : vector<16x1x32xf32> to vector<16x16x32xf32>
    %67 = arith.addf %65, %66 : vector<16x16x32xf32>
    %cst_17 = arith.constant 0.000000e+00 : f32
    %68 = vector.broadcast %cst_17 : f32 to vector<16x16x32xf32>
    %69 = arith.cmpf ogt, %67, %68 : vector<16x16x32xf32>
    %cst_18 = arith.constant 2.000000e-01 : f32
    %70 = vector.broadcast %cst_18 : f32 to vector<16x16x32xf32>
    %71 = arith.mulf %70, %67 : vector<16x16x32xf32>
    %72 = arith.select %69, %67, %71 : vector<16x16x32xi1>, vector<16x16x32xf32>
    %73 = vector.shape_cast %12 : vector<1x32xf32> to vector<1x1x32xf32>
    %74 = vector.broadcast %73 : vector<1x1x32xf32> to vector<16x16x32xf32>
    %75 = arith.mulf %72, %74 : vector<16x16x32xf32>
    %cst_19 = arith.constant dense<0.000000e+00> : vector<16x16xf32>
    %76 = vector.multi_reduction <add>, %75, %cst_19 [2] : vector<16x16x32xf32> to vector<16x16xf32>
    %cst_20 = arith.constant -1.000000e+30 : f32
    %77 = vector.broadcast %cst_20 : f32 to vector<16x16xf32>
    %78 = arith.select %3, %76, %77 : vector<16x16xi1>, vector<16x16xf32>
    %cst_21 = arith.constant dense<0xFF800000> : vector<16xf32>
    %79 = vector.multi_reduction <maximumf>, %78, %cst_21 [1] : vector<16x16xf32> to vector<16xf32>
    %80 = vector.shape_cast %79 : vector<16xf32> to vector<16x1xf32>
    %81 = vector.broadcast %80 : vector<16x1xf32> to vector<16x16xf32>
    %82 = arith.subf %78, %81 : vector<16x16xf32>
    %83 = math.exp %82 : vector<16x16xf32>
    %cst_22 = arith.constant dense<0.000000e+00> : vector<16xf32>
    %84 = vector.multi_reduction <add>, %83, %cst_22 [1] : vector<16x16xf32> to vector<16xf32>
    %85 = vector.shape_cast %84 : vector<16xf32> to vector<16x1xf32>
    %86 = tpu.reciprocal %85 {approx = true} : vector<16x1xf32> -> vector<16x1xf32>
    %87 = vector.broadcast %86 : vector<16x1xf32> to vector<16x16xf32>
    %88 = arith.mulf %83, %87 : vector<16x16xf32>
    %89 = arith.truncf %88 : vector<16x16xf32> to vector<16x16xbf16>
    %90 = arith.truncf %61 : vector<16x32xf32> to vector<16x32xbf16>
    %cst_23 = arith.constant dense<0.000000e+00> : vector<16x32xf32>
    %91 = tpu.matmul %89, %90, %cst_23 {dimension_numbers = #tpu.dot_dimension_numbers<[1], [0], [0], [1], [0, 0, 1, 1], [], []>} : vector<16x16xbf16>, vector<16x32xbf16>, vector<16x32xf32> -> vector<16x32xf32>
    %92 = vector.broadcast %14 : vector<1x32xf32> to vector<16x32xf32>
    %93 = arith.addf %91, %92 : vector<16x32xf32>
    %cst_24 = arith.constant 0.000000e+00 : f32
    %94 = vector.broadcast %cst_24 : f32 to vector<16x32xf32>
    %95 = arith.maximumf %93, %94 : vector<16x32xf32>
    %c0_25 = arith.constant 0 : index
    %c0_26 = arith.constant 0 : index
    %96 = vector.load %arg3[%c0_25, %c0_26] : memref<2x16xf32, #tpu.memory_space<vmem>>, vector<2x16xf32>
    %97 = arith.truncf %96 : vector<2x16xf32> to vector<2x16xbf16>
    %98 = arith.truncf %95 : vector<16x32xf32> to vector<16x32xbf16>
    %cst_27 = arith.constant dense<0.000000e+00> : vector<2x32xf32>
    %99 = tpu.matmul %97, %98, %cst_27 {dimension_numbers = #tpu.dot_dimension_numbers<[1], [0], [0], [1], [0, 0, 1, 1], [], []>} : vector<2x16xbf16>, vector<16x32xbf16>, vector<2x32xf32> -> vector<2x32xf32>
    %cst_28 = arith.constant dense<0.000000e+00> : vector<2x128xf32>
    %100 = tpu.matmul %99, %8, %cst_28 {dimension_numbers = #tpu.dot_dimension_numbers<[1], [0], [0], [1], [0, 0, 1, 1], [], []>} : vector<2x32xf32>, vector<32x128xf32>, vector<2x128xf32> -> vector<2x128xf32>
    %101 = vector.broadcast %15 : vector<1x128xf32> to vector<2x128xf32>
    %102 = arith.addf %100, %101 : vector<2x128xf32>
    %c0_29 = arith.constant 0 : index
    %c0_30 = arith.constant 0 : index
    %103 = vector.load %arg6[%c0_29, %c0_30] : memref<2x128xf32, #tpu.memory_space<vmem>>, vector<2x128xf32>
    tpu.vector_store %arg6[%c0_29, %c0_30], %102 {strides = array<i32>} : memref<2x128xf32, #tpu.memory_space<vmem>>, vector<2x128xf32>,
    return
  }
  func.func @transform_0(%arg0: i32) -> (i32, i32) {
    %c0_i32 = arith.constant 0 : i32
    %c0_i32_0 = arith.constant 0 : i32
    %c0_i32_1 = arith.constant 0 : i32
    return %c0_i32, %c0_i32_0 : i32, i32
  }
  func.func @transform_1(%arg0: i32) -> (i32, i32) {
    %c0_i32 = arith.constant 0 : i32
    %c0_i32_0 = arith.constant 0 : i32
    %c0_i32_1 = arith.constant 0 : i32
    return %c0_i32, %c0_i32_0 : i32, i32
  }
  func.func @transform_2(%arg0: i32) -> (i32, i32) {
    %c0_i32 = arith.constant 0 : i32
    %c0_i32_0 = arith.constant 0 : i32
    %c0_i32_1 = arith.constant 0 : i32
    return %c0_i32, %c0_i32_0 : i32, i32
  }
  func.func @transform_3(%arg0: i32) -> (i32, i32) {
    %c0_i32 = arith.constant 0 : i32
    %c0_i32_0 = arith.constant 0 : i32
    %c0_i32_1 = arith.constant 0 : i32
    return %c0_i32, %c0_i32_0 : i32, i32
  }
  func.func @transform_4(%arg0: i32) -> (i32, i32) {
    %c0_i32 = arith.constant 0 : i32
    %c0_i32_0 = arith.constant 0 : i32
    %c0_i32_1 = arith.constant 0 : i32
    return %c0_i32, %c0_i32_0 : i32, i32
  }
  func.func @transform_5(%arg0: i32) -> (i32, i32) {
    %c0_i32 = arith.constant 0 : i32
    %c0_i32_0 = arith.constant 0 : i32
    %c0_i32_1 = arith.constant 0 : i32
    return %c0_i32, %c0_i32_0 : i32, i32
  }
}

</mosaic_0001>

<bundles_post_ra>
// kernel: tpu_custom_call.1
= control target key start
LH: loop header
LB: loop body
LE: loop exit
PB: predicated region body
PF: predicated region fallthrough
CT: control target
= control target key end

     0   :  { %10 = vsyncpa [#allocation3], 0  ;;  %s2676_s0 = inlined_call_operand.hbm [shape: f32[16,24], index: 0, kind: input, shape index: {}]   ;;  %s2677_s1 = inlined_call_operand.hbm [shape: f32[16,16], index: 1, kind: input, shape index: {}]   ;;  %s2678_s2 = inlined_call_operand.vmem [shape: f32[2,16], index: 2, kind: input, shape index: {}]   ;;  %s2679_s3 = inlined_call_operand.hbm [shape: f32[88,128], index: 3, kind: input, shape index: {}]   ;;  %s2680_s4 = inlined_call_operand.vmem [shape: f32[8,128], index: 4, kind: input, shape index: {}]   ;;  %s2681_s5 = inlined_call_operand.hbm [shape: f32[2,128], index: 5, kind: output, shape index: {}]  }
   0x1   :  { %11 = vsyncpa [#allocation6], 0 }
   0x2   :  { %12 = vsyncpa [#allocation4], 0  ;;  %s2017_s18 = smov [#allocation5]   ;;  %s2018_s20 = smov [#allocation2]  }
   0x3   :  { %s30_s19 = sshll.u32 %s2017_s18, 4  ;;  %s18_s21 = sshll.u32 %s2018_s20, 4  ;;  %s31_s19 = int_to_ptr.vmem [resolvable:$true] %s30_s19  ;;  %s2058_s21 = int_to_ptr.vmem [resolvable:$true] %s18_s21 }
   0x4   :  { %s1923_s24 = scalar_lea.hbm %s2677_s1, 256 }
   0x5   :  { %p1924_p0 = scmp.ne.s32.totalorder %s2677_s1, %s1923_s24  ;;  %p1927_p1 = scmp.lt.u32.totalorder %s1923_s24, %s2677_s1 }
   0x7   :  { %p1929_p2 = pnand %p1927_p1, %p1924_p0 }
   0x9   :  { %1932 = shalt.err (!%p1929_p2)
}
   0xa   :  { %s1933_s29 = scalar_lea.vmem %s31_s19, 256  ;;  %p1938_p4 = scmp.lt.s32.totalorder %s31_s19, %s31_s19 }
   0xb   :  { %p1934_p3 = scmp.ne.s32.totalorder %s31_s19, %s1933_s29  ;;  %p1939_p5 = scmp.lt.s32.totalorder %s1933_s29, %s1933_s29 }
   0xd   :  { %p1940_p6 = por %p1939_p5, %p1938_p4 }
   0xf   :  { %p1941_p7 = pnand %p1940_p6, %p1934_p3 }
  0x11   :  { %1944 = shalt.err (!%p1941_p7)
}
  0x12   :  { %s2019_s30 = smov 128   ;;  %s2020_s6 = smov 8  }
  0x13   :  { %36 = dma.hbm_to_vmem [thread:$0]  %s2677_s1, 256, %s31_s19, [#allocation6], %s2019_s30, %s2019_s30, %s2020_s6  }
  0x14   :  { %s1945_s11 = scalar_lea.hbm %s2676_s0, 256 }
  0x15   :  { %p1946_p8 = scmp.ne.s32.totalorder %s2676_s0, %s1945_s11  ;;  %p1949_p9 = scmp.lt.u32.totalorder %s1945_s11, %s2676_s0 }
  0x17   :  { %p1951_p10 = pnand %p1949_p9, %p1946_p8 }
  0x19   :  { %1954 = shalt.err (!%p1951_p10)
}
  0x1a   :  { %s1955_s16 = scalar_lea.vmem %s2058_s21, 256  ;;  %p1960_p12 = scmp.lt.s32.totalorder %s2058_s21, %s2058_s21 }
  0x1b   :  { %p1956_p11 = scmp.ne.s32.totalorder %s2058_s21, %s1955_s16  ;;  %p1961_p13 = scmp.lt.s32.totalorder %s1955_s16, %s1955_s16 }
  0x1d   :  { %p1962_p0 = por %p1961_p13, %p1960_p12 }
  0x1f   :  { %p1963_p1 = pnand %p1962_p0, %p1956_p11 }
  0x21   :  { %1966 = shalt.err (!%p1963_p1)
}
  0x22   :  { %24 = dma.hbm_to_vmem [thread:$0]  %s2676_s0, 256, %s2058_s21, [#allocation3], %s2019_s30, %s2019_s30, %s2020_s6  }
  0x23   :  { %s2021_s18 = smov [#allocation7]   ;;  %s1967_s23 = scalar_lea.hbm %s2679_s3, 1408 }
  0x24   :  { %s44_s19 = sshll.u32 %s2021_s18, 4  ;;  %p1968_p2 = scmp.ne.s32.totalorder %s2679_s3, %s1967_s23  ;;  %s45_s19 = int_to_ptr.vmem [resolvable:$true] %s44_s19 }
  0x25   :  { %p1971_p3 = scmp.lt.u32.totalorder %s1967_s23, %s2679_s3 }
  0x27   :  { %p1973_p4 = pnand %p1971_p3, %p1968_p2 }
  0x29   :  { %1976 = shalt.err (!%p1973_p4)
}
  0x2a   :  { %s1977_s28 = scalar_lea.vmem %s45_s19, 1408  ;;  %p1982_p6 = scmp.lt.s32.totalorder %s45_s19, %s45_s19 }
  0x2b   :  { %p1978_p5 = scmp.ne.s32.totalorder %s45_s19, %s1977_s28  ;;  %p1983_p7 = scmp.lt.s32.totalorder %s1977_s28, %s1977_s28 }
  0x2d   :  { %p1984_p8 = por %p1983_p7, %p1982_p6 }
  0x2f   :  { %p1985_p9 = pnand %p1984_p8, %p1978_p5 }
  0x31   :  { %1988 = shalt.err (!%p1985_p9)
}
  0x32   :  { %50 = dma.hbm_to_vmem [thread:$0]  %s2679_s3, 1408, %s45_s19, [#allocation6], %s2019_s30, %s2019_s30, %s2020_s6  }
  0x33   :  { %2011 = dma.done.wait [#allocation3], 256  }
  0x34   :  { %2012 = vsyncadd [#allocation3], 4294967040 }
  0x35   :  { %2013 = dma.done.wait [#allocation6], 1664  }
  0x36   :  { %2014 = vsyncadd [#allocation6], 4294965632  ;;  %v2022_v0 = vmov 0.0   ;;  %vm2682_vm0 = vmmov 0   ;;  %v69_v1 = vld [vmem:[#allocation7] sm:$0xff]  ;;  %v70_v2 = vld [vmem:[#allocation7 + $0x8] sm:$0xff]  ;;  %v84_v10 = vlaneseq }
  0x37   :  { %1844 = vmatprep.subr.bf16.mxu0 %v2022_v0  ;;  %1848 = vmatprep.mubr.msk.bf16.mxu0 %vm2682_vm0, %v2022_v0  ;;  %v71_v3 = vld [vmem:[#allocation7 + $0x10] sm:$0xff]  ;;  %v82_v4 = vpack.c.bf16 %v70_v2, %v69_v1  ;;  %vm92_vm1 = vcmask 1043456   ;;  %v63_v6 = vld [vmem:[#allocation2] sm:$0xff]  ;;  %v64_v7 = vld [vmem:[#allocation2 + $0x8] sm:$0xff]  ;;  %vm88_vm2 = vcmask 195584   ;;  %s2025_s30 = smov 96  }
  0x38   :  { %1852 = vmatprep.subr.bf16.mxu1 %v2022_v0  ;;  %1854 = vmatprep.mubr.msk.bf16.mxu1 %vm2682_vm0, %v2022_v0  ;;  %v83_v5 = vpack.c.bf16 %v71_v3, %v71_v3  ;;  %v81_v9 = vpack.c.bf16 %v64_v7, %v63_v6  ;;  %v2121_v11 = vshrl.u32 %v84_v10, 7  ;;  %v2024_v12 = vmov 1966171168   ;;  %v2129_v15 = vld [vmem:[%s2680_s4] sm:$0xff] }
  0x39   :  { %1845 = vmatpush3.bf16.msra.mxu0 %v82_v4  ;;  %v141_v13 = vunpack.c.l.s4 %v2024_v12  ;;  %vm513_vm4 = vcmask 261120  }
  0x3a   :  { %1846 = vmatprep.subr.bf16.mxu0 %v2022_v0  ;;  %v94_v8 = vsel %vm92_vm1, %v83_v5, 0  ;;  %v2124_v14 = vsub.s32 0, %v2121_v11  ;;  %v479_v5 = vsub.s32 2, %v2121_v11 }
  0x3b   :  { %v142_v16 = vunpack.c.0.s8 %v141_v13 }
  0x3c   :  { %v87_v17 = vrot.slane %v2129_v15, %v2124_v14 }
  0x3d   :  { %1847 = vmatpush3.bf16.msra.mxu0 %v94_v8  ;;  %v2134_v18 = vsub.s32 %v142_v16, %v2121_v11 }
  0x3e   :  { %1866 = vmatprep.subr.bf16.mxu0 %v2022_v0 }
  0x40   :  { %1849 = vmatmul.mubr.msk.bf16.vlgmr.msra.gmra.mrb[0].mxu0 %vm88_vm2, %v81_v9  ;;  %v2197_v9 = vrot.slane %v2129_v15, %v479_v5 }
  0x41   :  { %1868 = vmatprep.mubr.msk.bf16.mxu0 %vm2682_vm0, %v2022_v0 }
 0x113   :  { %v130_v19 = vpop.f32.mrb[0].mxu0 }
 0x114   :  { %v2136_v20 = vadd.f32 %v130_v19, %v87_v17  ;;  %v1850_v21 = vpop.f32.mrb[1].mxu0 }
 0x115   :  { %v133_v22 = vpop.f32.mrb[2].mxu0 }
 0x116   :  { %v2138_v23 = vadd.f32 %v133_v22, %v87_v17  ;;  %v1851_v24 = vpop.f32.mrb[3].mxu0  ;;  %v146_v25 = vrot.slane %v2136_v20, %v2134_v18  ;;  %v139_v33 = vcombine.high %v2136_v20, %v2136_v20 }
 0x118   :  { %v839_v26 = vpack.c.bf16 %v2138_v23, %v2136_v20  ;;  %v162_v27 = vrot.slane %v146_v25, %v2134_v18  ;;  %v154_v28 = vcombine.high %v146_v25, %v146_v25  ;;  %v195_v29 = vrot.slane %v2138_v23, %v2134_v18 }
 0x119   :  { %v188_v37 = vcombine.high %v2138_v23, %v2138_v23  ;;  %v153_v40 = vrot.slane %v139_v33, %v2134_v18 }
 0x11a   :  { %1853 = vmatpush3.bf16.msra.mxu1 %v839_v26  ;;  %v240_v30 = vrot.slane %v162_v27, %v2124_v14  ;;  %v211_v31 = vrot.slane %v195_v29, %v2134_v18  ;;  %v203_v32 = vcombine.high %v195_v29, %v195_v29  ;;  %v176_v34 = vrot.slane %v154_v28, %v2134_v18 }
 0x11b   :  { %1858 = vmatprep.subr.bf16.mxu1 %v2022_v0  ;;  %v184_v38 = vcombine.high %v162_v27, %v162_v27  ;;  %v202_v43 = vrot.slane %v188_v37, %v2134_v18  ;;  %v169_v45 = vrot.slane %v153_v40, %v2134_v18  ;;  %v155_v50 = vcombine.high %v153_v40, %v153_v40 }
 0x11c   :  { %301 = vrot.lane.b32.xlu0 %v240_v30, %s2025_s30  ;;  %v272_v35 = vrot.slane %v211_v31, %v2124_v14  ;;  %v225_v36 = vrot.slane %v203_v32, %v2134_v18  ;;  %v244_v39 = vrot.slane %v176_v34, %v2124_v14  ;;  %v233_v41 = vcombine.high %v211_v31, %v211_v31 }
 0x11d   :  { %v248_v44 = vrot.slane %v184_v38, %v2124_v14  ;;  %v218_v47 = vrot.slane %v202_v43, %v2134_v18  ;;  %v256_v48 = vrot.slane %v169_v45, %v2124_v14  ;;  %v186_v49 = vcombine.high %v176_v34, %v176_v34 }
 0x11e   :  { %317 = vrot.lane.b32.xlu1 %v272_v35, %s2025_s30  ;;  %v276_v42 = vrot.slane %v225_v36, %v2124_v14  ;;  %v280_v46 = vrot.slane %v233_v41, %v2124_v14  ;;  %v235_v52 = vcombine.high %v225_v36, %v225_v36  ;;  %v204_v53 = vcombine.high %v202_v43, %v202_v43 }
 0x11f   :  { %v288_v51 = vrot.slane %v218_v47, %v2124_v14  ;;  %v252_v54 = vrot.slane %v186_v49, %v2124_v14  ;;  %v183_v55 = vrot.slane %v155_v50, %v2134_v18  ;;  %v185_v59 = vcombine.high %v169_v45, %v169_v45 }
 0x120   :  { %303 = vrot.lane.b32.xlu0 %v244_v39, %s2025_s30  ;;  %v284_v56 = vrot.slane %v235_v52, %v2124_v14  ;;  %v232_v57 = vrot.slane %v204_v53, %v2134_v18  ;;  %v234_v61 = vcombine.high %v218_v47, %v218_v47 }
 0x121   :  { %v260_v58 = vrot.slane %v183_v55, %v2124_v14  ;;  %v264_v62 = vrot.slane %v185_v59, %v2124_v14  ;;  %v187_v63 = vcombine.high %v183_v55, %v183_v55 }
 0x122   :  { %319 = vrot.lane.b32.xlu1 %v276_v42, %s2025_s30  ;;  %v292_v60 = vrot.slane %v232_v57, %v2124_v14  ;;  %v296_v1 = vrot.slane %v234_v61, %v2124_v14  ;;  %v236_v2 = vcombine.high %v232_v57, %v232_v57 }
 0x123   :  { %v268_v3 = vrot.slane %v187_v63, %v2124_v14 }
 0x124   :  { %305 = vrot.lane.b32.xlu0 %v248_v44, %s2025_s30  ;;  %v300_v4 = vrot.slane %v236_v2, %v2124_v14 }
 0x126   :  { %321 = vrot.lane.b32.xlu1 %v280_v46, %s2025_s30 }
 0x128   :  { %309 = vrot.lane.b32.xlu0 %v256_v48, %s2025_s30 }
 0x12a   :  { %325 = vrot.lane.b32.xlu1 %v288_v51, %s2025_s30 }
 0x12c   :  { %307 = vrot.lane.b32.xlu0 %v252_v54, %s2025_s30 }
 0x12e   :  { %323 = vrot.lane.b32.xlu1 %v284_v56, %s2025_s30 }
 0x130   :  { %311 = vrot.lane.b32.xlu0 %v260_v58, %s2025_s30 }
 0x132   :  { %327 = vrot.lane.b32.xlu1 %v292_v60, %s2025_s30 }
 0x134   :  { %313 = vrot.lane.b32.xlu0 %v264_v62, %s2025_s30 }
 0x136   :  { %329 = vrot.lane.b32.xlu1 %v296_v1, %s2025_s30 }
 0x138   :  { %315 = vrot.lane.b32.xlu0 %v268_v3, %s2025_s30 }
 0x13a   :  { %331 = vrot.lane.b32.xlu1 %v300_v4, %s2025_s30 }
 0x18e   :  { %v302_v6 = vpop.permute.xlu0 %301 }
 0x18f   :  { %v349_v7 = vadd.f32 %v302_v6, %v2136_v20  ;;  %v350_v8 = vadd.f32 %v302_v6, %v2138_v23 }
 0x190   :  { %v318_v12 = vpop.permute.xlu1 %317 }
 0x191   :  { %v365_v13 = vadd.f32 %v318_v12, %v2136_v20  ;;  %vm381_vm3 = vcmp.gt.f32.partialorder %v349_v7, 0.0  ;;  %v413_v16 = vmul.f32 0.2, %v349_v7  ;;  %vm382_vm5 = vcmp.gt.f32.partialorder %v350_v8, 0.0 }
 0x192   :  { %v304_v17 = vpop.permute.xlu0 %303  ;;  %v414_v19 = vmul.f32 0.2, %v350_v8  ;;  %v366_v25 = vadd.f32 %v318_v12, %v2138_v23 }
 0x193   :  { %v351_v21 = vadd.f32 %v304_v17, %v2136_v20  ;;  %v352_v22 = vadd.f32 %v304_v17, %v2138_v23  ;;  %v445_v24 = vsel %vm381_vm3, %v349_v7, %v413_v16  ;;  %vm397_vm6 = vcmp.gt.f32.partialorder %v365_v13, 0.0 }
 0x194   :  { %v481_v26 = vmul.f32 %v2197_v9, %v445_v24  ;;  %v446_v27 = vsel %vm382_vm5, %v350_v8, %v414_v19  ;;  %v429_v28 = vmul.f32 0.2, %v365_v13  ;;  %v320_v29 = vpop.permute.xlu1 %319  ;;  %v430_v40 = vmul.f32 0.2, %v366_v25 }
 0x195   :  { %v482_v30 = vmul.f32 %v2197_v9, %v446_v27  ;;  %vm383_vm7 = vcmp.gt.f32.partialorder %v351_v21, 0.0  ;;  %v415_v33 = vmul.f32 0.2, %v351_v21  ;;  %vm384_vm8 = vcmp.gt.f32.partialorder %v352_v22, 0.0 }
 0x196   :  { %v306_v31 = vpop.permute.xlu0 %305  ;;  %v514_v32 = vsel %vm513_vm4, %v481_v26, 0.0  ;;  %v461_v34 = vsel %vm397_vm6, %v365_v13, %v429_v28  ;;  %v416_v39 = vmul.f32 0.2, %v352_v22  ;;  %vm398_vm9 = vcmp.gt.f32.partialorder %v366_v25, 0.0 }
 0x197   :  { %v353_v35 = vadd.f32 %v306_v31, %v2136_v20  ;;  %515 = vadd.xlane.f32.xlu0 %v514_v32  ;;  %v517_v36 = vsel %vm513_vm4, %v482_v30, 0.0  ;;  %v497_v37 = vmul.f32 %v2197_v9, %v461_v34  ;;  %v447_v38 = vsel %vm383_vm7, %v351_v21, %v415_v33 }
 0x198   :  { %518 = vadd.xlane.f32.xlu1 %v517_v36  ;;  %v483_v41 = vmul.f32 %v2197_v9, %v447_v38  ;;  %v367_v42 = vadd.f32 %v320_v29, %v2136_v20  ;;  %v448_v44 = vsel %vm384_vm8, %v352_v22, %v416_v39  ;;  %v354_v46 = vadd.f32 %v306_v31, %v2138_v23  ;;  %v322_v47 = vpop.permute.xlu1 %321 }
 0x199   :  { %vm385_vm10 = vcmp.gt.f32.partialorder %v353_v35, 0.0  ;;  %v417_v45 = vmul.f32 0.2, %v353_v35  ;;  %v562_v49 = vsel %vm513_vm4, %v497_v37, 0.0  ;;  %v484_v51 = vmul.f32 %v2197_v9, %v448_v44 }
 0x19a   :  { %v310_v43 = vpop.permute.xlu0 %309  ;;  %v520_v50 = vsel %vm513_vm4, %v483_v41, 0.0  ;;  %v462_v53 = vsel %vm398_vm9, %v366_v25, %v430_v40  ;;  %v369_v55 = vadd.f32 %v322_v47, %v2136_v20  ;;  %vm399_vm12 = vcmp.gt.f32.partialorder %v367_v42, 0.0 }
 0x19b   :  { %v357_v48 = vadd.f32 %v310_v43, %v2136_v20  ;;  %v449_v52 = vsel %vm385_vm10, %v353_v35, %v417_v45  ;;  %521 = vadd.xlane.f32.xlu0 %v520_v50  ;;  %v358_v58 = vadd.f32 %v310_v43, %v2138_v23  ;;  %v523_v59 = vsel %vm513_vm4, %v484_v51, 0.0 }
 0x19c   :  { %563 = vadd.xlane.f32.xlu1 %v562_v49  ;;  %v485_v54 = vmul.f32 %v2197_v9, %v449_v52  ;;  %v498_v60 = vmul.f32 %v2197_v9, %v462_v53  ;;  %vm386_vm13 = vcmp.gt.f32.partialorder %v354_v46, 0.0  ;;  %v418_v63 = vmul.f32 0.2, %v354_v46  ;;  %v326_v12 = vpop.permute.xlu1 %325 }
 0x19d   :  { %vm389_vm11 = vcmp.gt.f32.partialorder %v357_v48, 0.0  ;;  %v421_v57 = vmul.f32 0.2, %v357_v48  ;;  %v431_v1 = vmul.f32 0.2, %v367_v42  ;;  %v368_v2 = vadd.f32 %v320_v29, %v2138_v23 }
 0x19e   :  { %v308_v56 = vpop.permute.xlu0 %307  ;;  %v526_v61 = vsel %vm513_vm4, %v485_v54, 0.0  ;;  %v450_v4 = vsel %vm386_vm13, %v354_v46, %v418_v63  ;;  %v433_v6 = vmul.f32 0.2, %v369_v55  ;;  %v565_v8 = vsel %vm513_vm4, %v498_v60, 0.0 }
 0x19f   :  { %v453_v62 = vsel %vm389_vm11, %v357_v48, %v421_v57  ;;  %524 = vadd.xlane.f32.xlu0 %v523_v59  ;;  %v463_v5 = vsel %vm399_vm12, %v367_v42, %v431_v1  ;;  %v355_v7 = vadd.f32 %v308_v56, %v2136_v20  ;;  %vm390_vm14 = vcmp.gt.f32.partialorder %v358_v58, 0.0 }
 0x1a0   :  { %527 = vadd.xlane.f32.xlu1 %v526_v61  ;;  %v489_v3 = vmul.f32 %v2197_v9, %v453_v62  ;;  %v486_v17 = vmul.f32 %v2197_v9, %v450_v4  ;;  %v499_v19 = vmul.f32 %v2197_v9, %v463_v5  ;;  %v422_v21 = vmul.f32 0.2, %v358_v58  ;;  %v324_v36 = vpop.permute.xlu1 %323 }
 0x1a1   :  { %v370_v22 = vadd.f32 %v322_v47, %v2138_v23  ;;  %vm401_vm15 = vcmp.gt.f32.partialorder %v369_v55, 0.0  ;;  %v373_v25 = vadd.f32 %v326_v12, %v2136_v20  ;;  %v419_v26 = vmul.f32 0.2, %v355_v7 }
 0x1a2   :  { %v312_v13 = vpop.permute.xlu0 %311  ;;  %v538_v16 = vsel %vm513_vm4, %v489_v3, 0.0  ;;  %v454_v24 = vsel %vm390_vm14, %v358_v58, %v422_v21  ;;  %v529_v27 = vsel %vm513_vm4, %v486_v17, 0.0  ;;  %v568_v28 = vsel %vm513_vm4, %v499_v19, 0.0 }
 0x1a3   :  { %566 = vadd.xlane.f32.xlu0 %v565_v8  ;;  %v490_v29 = vmul.f32 %v2197_v9, %v454_v24  ;;  %v465_v30 = vsel %vm401_vm15, %v369_v55, %v433_v6  ;;  %vm400_vm1 = vcmp.gt.f32.partialorder %v368_v2, 0.0  ;;  %v432_v31 = vmul.f32 0.2, %v368_v2 }
 0x1a4   :  { %539 = vadd.xlane.f32.xlu1 %v538_v16  ;;  %v434_v32 = vmul.f32 0.2, %v370_v22  ;;  %v356_v33 = vadd.f32 %v308_v56, %v2138_v23  ;;  %v359_v34 = vadd.f32 %v312_v13, %v2136_v20  ;;  %v374_v35 = vadd.f32 %v326_v12, %v2138_v23  ;;  %v328_v55 = vpop.permute.xlu1 %327 }
 0x1a5   :  { %v501_v38 = vmul.f32 %v2197_v9, %v465_v30  ;;  %v464_v39 = vsel %vm400_vm1, %v368_v2, %v432_v31  ;;  %vm387_vm2 = vcmp.gt.f32.partialorder %v355_v7, 0.0  ;;  %v437_v40 = vmul.f32 0.2, %v373_v25 }
 0x1a6   :  { %v314_v37 = vpop.permute.xlu0 %313  ;;  %v541_v41 = vsel %vm513_vm4, %v490_v29, 0.0  ;;  %v500_v43 = vmul.f32 %v2197_v9, %v464_v39  ;;  %v451_v44 = vsel %vm387_vm2, %v355_v7, %v419_v26  ;;  %vm402_vm3 = vcmp.gt.f32.partialorder %v370_v22, 0.0 }
 0x1a7   :  { %530 = vadd.xlane.f32.xlu0 %v529_v27  ;;  %v574_v42 = vsel %vm513_vm4, %v501_v38, 0.0  ;;  %v420_v45 = vmul.f32 0.2, %v356_v33  ;;  %v423_v46 = vmul.f32 0.2, %v359_v34  ;;  %v361_v47 = vadd.f32 %v314_v37, %v2136_v20 }
 0x1a8   :  { %569 = vadd.xlane.f32.xlu1 %v568_v28  ;;  %v438_v48 = vmul.f32 0.2, %v374_v35  ;;  %v487_v49 = vmul.f32 %v2197_v9, %v451_v44  ;;  %v466_v50 = vsel %vm402_vm3, %v370_v22, %v434_v32  ;;  %vm405_vm5 = vcmp.gt.f32.partialorder %v373_v25, 0.0  ;;  %v330_v12 = vpop.permute.xlu1 %329 }
 0x1a9   :  { %v371_v51 = vadd.f32 %v324_v36, %v2136_v20  ;;  %v571_v52 = vsel %vm513_vm4, %v500_v43, 0.0  ;;  %v502_v53 = vmul.f32 %v2197_v9, %v466_v50  ;;  %v469_v54 = vsel %vm405_vm5, %v373_v25, %v437_v40 }
 0x1aa   :  { %v532_v56 = vsel %vm513_vm4, %v487_v49, 0.0  ;;  %v505_v57 = vmul.f32 %v2197_v9, %v469_v54  ;;  %vm388_vm6 = vcmp.gt.f32.partialorder %v356_v33, 0.0  ;;  %vm391_vm7 = vcmp.gt.f32.partialorder %v359_v34, 0.0  ;;  %v316_v28 = vpop.permute.xlu0 %315 }
 0x1ab   :  { %542 = vadd.xlane.f32.xlu0 %v541_v41  ;;  %v360_v58 = vadd.f32 %v312_v13, %v2138_v23  ;;  %v425_v59 = vmul.f32 0.2, %v361_v47  ;;  %v452_v60 = vsel %vm388_vm6, %v356_v33, %v420_v45  ;;  %v455_v61 = vsel %vm391_vm7, %v359_v34, %v423_v46 }
 0x1ac   :  { %575 = vadd.xlane.f32.xlu1 %v574_v42  ;;  %vm406_vm8 = vcmp.gt.f32.partialorder %v374_v35, 0.0  ;;  %v435_v62 = vmul.f32 0.2, %v371_v51  ;;  %v375_v63 = vadd.f32 %v328_v55, %v2136_v20  ;;  %vm393_vm9 = vcmp.gt.f32.partialorder %v361_v47, 0.0  ;;  %v332_v39 = vpop.permute.xlu1 %331 }
 0x1ad   :  { %v577_v1 = vsel %vm513_vm4, %v502_v53, 0.0  ;;  %v586_v2 = vsel %vm513_vm4, %v505_v57, 0.0  ;;  %v488_v3 = vmul.f32 %v2197_v9, %v452_v60  ;;  %v491_v4 = vmul.f32 %v2197_v9, %v455_v61 }
 0x1ae   :  { %v424_v5 = vmul.f32 0.2, %v360_v58  ;;  %v362_v6 = vadd.f32 %v314_v37, %v2138_v23  ;;  %v470_v7 = vsel %vm406_vm8, %v374_v35, %v438_v48  ;;  %v457_v8 = vsel %vm393_vm9, %v361_v47, %v425_v59 }
 0x1af   :  { %572 = vadd.xlane.f32.xlu0 %v571_v52  ;;  %vm392_vm10 = vcmp.gt.f32.partialorder %v360_v58, 0.0  ;;  %vm403_vm11 = vcmp.gt.f32.partialorder %v371_v51, 0.0  ;;  %v372_v13 = vadd.f32 %v324_v36, %v2138_v23  ;;  %v439_v16 = vmul.f32 0.2, %v375_v63 }
 0x1b0   :  { %533 = vadd.xlane.f32.xlu1 %v532_v56  ;;  %v535_v17 = vsel %vm513_vm4, %v488_v3, 0.0  ;;  %v544_v19 = vsel %vm513_vm4, %v491_v4, 0.0  ;;  %v506_v21 = vmul.f32 %v2197_v9, %v470_v7  ;;  %v493_v22 = vmul.f32 %v2197_v9, %v457_v8 }
 0x1b1   :  { %v426_v24 = vmul.f32 0.2, %v362_v6  ;;  %v377_v25 = vadd.f32 %v330_v12, %v2136_v20  ;;  %v456_v26 = vsel %vm392_vm10, %v360_v58, %v424_v5  ;;  %v467_v27 = vsel %vm403_vm11, %v371_v51, %v435_v62 }
 0x1b2   :  { %vm394_vm12 = vcmp.gt.f32.partialorder %v362_v6, 0.0  ;;  %vm407_vm13 = vcmp.gt.f32.partialorder %v375_v63, 0.0  ;;  %v436_v29 = vmul.f32 0.2, %v372_v13  ;;  %v376_v30 = vadd.f32 %v328_v55, %v2138_v23 }
 0x1b3   :  { %578 = vadd.xlane.f32.xlu0 %v577_v1  ;;  %v589_v31 = vsel %vm513_vm4, %v506_v21, 0.0  ;;  %v550_v32 = vsel %vm513_vm4, %v493_v22, 0.0  ;;  %v492_v33 = vmul.f32 %v2197_v9, %v456_v26  ;;  %v503_v34 = vmul.f32 %v2197_v9, %v467_v27 }
 0x1b4   :  { %587 = vadd.xlane.f32.xlu1 %v586_v2  ;;  %v441_v35 = vmul.f32 0.2, %v377_v25  ;;  %v363_v36 = vadd.f32 %v316_v28, %v2136_v20  ;;  %v458_v37 = vsel %vm394_vm12, %v362_v6, %v426_v24  ;;  %v471_v38 = vsel %vm407_vm13, %v375_v63, %v439_v16 }
 0x1b5   :  { %vm404_vm14 = vcmp.gt.f32.partialorder %v372_v13, 0.0  ;;  %vm409_vm15 = vcmp.gt.f32.partialorder %v377_v25, 0.0  ;;  %v440_v40 = vmul.f32 0.2, %v376_v30  ;;  %v378_v41 = vadd.f32 %v330_v12, %v2138_v23 }
 0x1b6   :  { %v547_v42 = vsel %vm513_vm4, %v492_v33, 0.0  ;;  %v580_v43 = vsel %vm513_vm4, %v503_v34, 0.0  ;;  %v494_v44 = vmul.f32 %v2197_v9, %v458_v37  ;;  %v507_v45 = vmul.f32 %v2197_v9, %v471_v38 }
 0x1b7   :  { %536 = vadd.xlane.f32.xlu0 %v535_v17  ;;  %v427_v46 = vmul.f32 0.2, %v363_v36  ;;  %v379_v47 = vadd.f32 %v332_v39, %v2136_v20  ;;  %v468_v48 = vsel %vm404_vm14, %v372_v13, %v436_v29  ;;  %v473_v49 = vsel %vm409_vm15, %v377_v25, %v441_v35 }
 0x1b8   :  { %545 = vadd.xlane.f32.xlu1 %v544_v19  ;;  %vm408_vm1 = vcmp.gt.f32.partialorder %v376_v30, 0.0  ;;  %vm395_vm2 = vcmp.gt.f32.partialorder %v363_v36, 0.0  ;;  %v442_v50 = vmul.f32 0.2, %v378_v41  ;;  %v553_v51 = vsel %vm513_vm4, %v494_v44, 0.0 }
 0x1b9   :  { %v592_v52 = vsel %vm513_vm4, %v507_v45, 0.0  ;;  %v504_v53 = vmul.f32 %v2197_v9, %v468_v48  ;;  %v509_v54 = vmul.f32 %v2197_v9, %v473_v49  ;;  %v364_v55 = vadd.f32 %v316_v28, %v2138_v23 }
 0x1ba   :  { %v443_v56 = vmul.f32 0.2, %v379_v47  ;;  %v472_v20 = vsel %vm408_vm1, %v376_v30, %v440_v40  ;;  %v459_v57 = vsel %vm395_vm2, %v363_v36, %v427_v46  ;;  %vm410_vm3 = vcmp.gt.f32.partialorder %v378_v41, 0.0 }
 0x1bb   :  { %590 = vadd.xlane.f32.xlu0 %v589_v31  ;;  %vm411_vm5 = vcmp.gt.f32.partialorder %v379_v47, 0.0  ;;  %v583_v58 = vsel %vm513_vm4, %v504_v53, 0.0  ;;  %v598_v59 = vsel %vm513_vm4, %v509_v54, 0.0  ;;  %v508_v60 = vmul.f32 %v2197_v9, %v472_v20  ;;  %v2324_v20 = vld [vmem:[#allocation5] sm:$0xff] }
 0x1bc   :  { %551 = vadd.xlane.f32.xlu1 %v550_v32  ;;  %v495_v61 = vmul.f32 %v2197_v9, %v459_v57  ;;  %v428_v62 = vmul.f32 0.2, %v364_v55  ;;  %v380_v63 = vadd.f32 %v332_v39, %v2138_v23  ;;  %v474_v1 = vsel %vm410_vm3, %v378_v41, %v442_v50 }
 0x1bd   :  { %v475_v2 = vsel %vm411_vm5, %v379_v47, %v443_v56  ;;  %vm396_vm6 = vcmp.gt.f32.partialorder %v364_v55, 0.0  ;;  %v595_v3 = vsel %vm513_vm4, %v508_v60, 0.0  ;;  %v510_v5 = vmul.f32 %v2197_v9, %v474_v1 }
 0x1be   :  { %v556_v4 = vsel %vm513_vm4, %v495_v61, 0.0  ;;  %v511_v6 = vmul.f32 %v2197_v9, %v475_v2  ;;  %v444_v7 = vmul.f32 0.2, %v380_v63  ;;  %v460_v8 = vsel %vm396_vm6, %v364_v55, %v428_v62 }
 0x1bf   :  { %548 = vadd.xlane.f32.xlu0 %v547_v42  ;;  %vm412_vm7 = vcmp.gt.f32.partialorder %v380_v63, 0.0  ;;  %v601_v23 = vsel %vm513_vm4, %v510_v5, 0.0  ;;  %v496_v13 = vmul.f32 %v2197_v9, %v460_v8  ;;  %v643_v40 = vand.u32 127, %v84_v10 }
 0x1c0   :  { %581 = vadd.xlane.f32.xlu1 %v580_v43  ;;  %v604_v12 = vsel %vm513_vm4, %v511_v6, 0.0  ;;  %v476_v16 = vsel %vm412_vm7, %v380_v63, %v444_v7  ;;  %vm653_vm8 = vcmask 130112   ;;  %vm790_vm9 = vcmask 1041409  }
 0x1c1   :  { %v559_v17 = vsel %vm513_vm4, %v496_v13, 0.0  ;;  %v512_v19 = vmul.f32 %v2197_v9, %v476_v16  ;;  %v648_v43 = vadd.s32 4294967288, %v643_v40  ;;  %v2309_v46 = vsub.s32 %v643_v40, %v2121_v11 }
 0x1c2   :  { %vm792_vm10 = vcmask 1042434   ;;  %vm794_vm11 = vcmask 1043459   ;;  %vm796_vm12 = vcmask 1044484   ;;  %vm798_vm13 = vcmask 1045509  }
 0x1c3   :  { %554 = vadd.xlane.f32.xlu0 %v553_v51  ;;  %v607_v21 = vsel %vm513_vm4, %v512_v19, 0.0  ;;  %v2312_v47 = vsub.s32 %v648_v43, %v2121_v11  ;;  %vm800_vm14 = vcmask 1046534   ;;  %vm802_vm15 = vcmask 1047559  }
 0x1c4   :  { %593 = vadd.xlane.f32.xlu1 %v592_v52  ;;  %vm67_vm1 = vcmp.gt.f32.partialorder %v2324_v20, 0.5  ;;  %vm815_vm2 = vcmask 130048  }
 0x1c7   :  { %584 = vadd.xlane.f32.xlu0 %v583_v58 }
 0x1c8   :  { %599 = vadd.xlane.f32.xlu1 %v598_v59 }
 0x1cb   :  { %596 = vadd.xlane.f32.xlu0 %v595_v3 }
 0x1cc   :  { %557 = vadd.xlane.f32.xlu1 %v556_v4 }
 0x1cf   :  { %602 = vadd.xlane.f32.xlu0 %v601_v23 }
 0x1d0   :  { %605 = vadd.xlane.f32.xlu1 %v604_v12 }
 0x1d3   :  { %560 = vadd.xlane.f32.xlu0 %v559_v17 }
 0x1d7   :  { %608 = vadd.xlane.f32.xlu0 %v607_v21 }
 0x224   :  { %v516_v22 = vpop.xlane.xlu0 %515 }
 0x225   :  { %v519_v24 = vpop.xlane.xlu1 %518  ;;  %v647_v50 = vrot.slane %v516_v22, %v2309_v46 }
 0x226   :  { %v652_v10 = vrot.slane %v519_v24, %v2312_v47 }
 0x228   :  { %v522_v26 = vpop.xlane.xlu0 %521  ;;  %v654_v57 = vsel %vm653_vm8, %v652_v10, %v647_v50 }
 0x229   :  { %v2293_v25 = vpop.xlane.xlu1 %563  ;;  %v658_v55 = vrot.slane %v522_v26, %v2309_v46 }
 0x22a   :  { %v721_v61 = vrot.slane %v2293_v25, %v2309_v46 }
 0x22c   :  { %v525_v27 = vpop.xlane.xlu0 %524 }
 0x22d   :  { %v528_v28 = vpop.xlane.xlu1 %527  ;;  %v662_v52 = vrot.slane %v525_v27, %v2312_v47 }
 0x22e   :  { %v667_v58 = vrot.slane %v528_v28, %v2309_v46 }
 0x22f   :  { %v663_v62 = vsel %vm653_vm8, %v662_v52, %v658_v55 }
 0x230   :  { %v2295_v29 = vpop.xlane.xlu0 %566  ;;  %v791_v12 = vsel %vm790_vm9, %v663_v62, %v654_v57 }
 0x231   :  { %v2297_v30 = vpop.xlane.xlu1 %539  ;;  %v725_v2 = vrot.slane %v2295_v29, %v2312_v47 }
 0x232   :  { %v685_v13 = vrot.slane %v2297_v30, %v2309_v46 }
 0x233   :  { %v726_v27 = vsel %vm653_vm8, %v725_v2, %v721_v61 }
 0x234   :  { %v531_v31 = vpop.xlane.xlu0 %530 }
 0x235   :  { %v570_v32 = vpop.xlane.xlu1 %569  ;;  %v671_v53 = vrot.slane %v531_v31, %v2312_v47 }
 0x236   :  { %v730_v4 = vrot.slane %v570_v32, %v2309_v46 }
 0x237   :  { %v672_v3 = vsel %vm653_vm8, %v671_v53, %v667_v58  ;;  %v2382_v53 = vld [vmem:[#allocation5 + $0x8] sm:$0xff] }
 0x238   :  { %v2299_v33 = vpop.xlane.xlu0 %542  ;;  %v793_v22 = vsel %vm792_vm10, %v672_v3, %v791_v12  ;;  %vm2683_vm3 = vcmp.gt.f32.partialorder %v2382_v53, 0.5 }
 0x239   :  { %v576_v9 = vpop.xlane.xlu1 %575  ;;  %v689_v5 = vrot.slane %v2299_v33, %v2312_v47 }
 0x23a   :  { %v739_v6 = vrot.slane %v576_v9, %v2309_v46 }
 0x23b   :  { %v690_v28 = vsel %vm653_vm8, %v689_v5, %v685_v13 }
 0x23c   :  { %v573_v34 = vpop.xlane.xlu0 %572 }
 0x23d   :  { %v534_v35 = vpop.xlane.xlu1 %533  ;;  %v734_v59 = vrot.slane %v573_v34, %v2312_v47 }
 0x23e   :  { %v676_v63 = vrot.slane %v534_v35, %v2309_v46 }
 0x23f   :  { %v735_v16 = vsel %vm653_vm8, %v734_v59, %v730_v4 }
 0x240   :  { %v579_v36 = vpop.xlane.xlu0 %578  ;;  %v804_v31 = vsel %vm790_vm9, %v735_v16, %v726_v27 }
 0x241   :  { %v2301_v37 = vpop.xlane.xlu1 %587  ;;  %v743_v1 = vrot.slane %v579_v36, %v2312_v47 }
 0x243   :  { %v744_v24 = vsel %vm653_vm8, %v743_v1, %v739_v6 }
 0x244   :  { %v537_v38 = vpop.xlane.xlu0 %536  ;;  %v805_v34 = vsel %vm792_vm10, %v744_v24, %v804_v31  ;;  %v74_v31 = vld [vmem:[#allocation7 + $0x28] sm:$0xff] }
 0x245   :  { %v546_v39 = vpop.xlane.xlu1 %545  ;;  %v680_v56 = vrot.slane %v537_v38, %v2312_v47 }
 0x246   :  { %v694_v25 = vrot.slane %v546_v39, %v2309_v46 }
 0x247   :  { %v681_v7 = vsel %vm653_vm8, %v680_v56, %v676_v63 }
 0x248   :  { %v2304_v41 = vpop.xlane.xlu0 %590  ;;  %v795_v29 = vsel %vm794_vm11, %v681_v7, %v793_v22 }
 0x249   :  { %v2306_v42 = vpop.xlane.xlu1 %551  ;;  %v761_v35 = vrot.slane %v2304_v41, %v2312_v47 }
 0x24a   :  { %v703_v30 = vrot.slane %v2306_v42, %v2309_v46 }
 0x24c   :  { %v549_v44 = vpop.xlane.xlu0 %548 }
 0x24d   :  { %v582_v45 = vpop.xlane.xlu1 %581  ;;  %v698_v8 = vrot.slane %v549_v44, %v2312_v47  ;;  %v797_v44 = vsel %vm796_vm12, %v690_v28, %v795_v29  ;;  %v72_v29 = vld [vmem:[#allocation7 + $0x18] sm:$0xff] }
 0x24e   :  { %v748_v26 = vrot.slane %v582_v45, %v2309_v46  ;;  %v757_v45 = vrot.slane %v2301_v37, %v2309_v46 }
 0x24f   :  { %v699_v32 = vsel %vm653_vm8, %v698_v8, %v694_v25 }
 0x250   :  { %v555_v48 = vpop.xlane.xlu0 %554  ;;  %v799_v10 = vsel %vm798_vm13, %v699_v32, %v797_v44  ;;  %v762_v55 = vsel %vm653_vm8, %v761_v35, %v757_v45 }
 0x251   :  { %v2314_v49 = vpop.xlane.xlu1 %593  ;;  %v707_v17 = vrot.slane %v555_v48, %v2312_v47 }
 0x252   :  { %v766_v40 = vrot.slane %v2314_v49, %v2309_v46 }
 0x253   :  { %v708_v36 = vsel %vm653_vm8, %v707_v17, %v703_v30  ;;  %v73_v30 = vld [vmem:[#allocation7 + $0x20] sm:$0xff] }
 0x254   :  { %v585_v51 = vpop.xlane.xlu0 %584  ;;  %v801_v52 = vsel %vm800_vm14, %v708_v36, %v799_v10  ;;  %v891_v32 = vpack.c.bf16 %v73_v30, %v72_v29 }
 0x255   :  { %v2320_v54 = vpop.xlane.xlu1 %599  ;;  %v752_v23 = vrot.slane %v585_v51, %v2312_v47 }
 0x256   :  { %v775_v41 = vrot.slane %v2320_v54, %v2309_v46 }
 0x257   :  { %v753_v33 = vsel %vm653_vm8, %v752_v23, %v748_v26 }
 0x258   :  { %v597_v60 = vpop.xlane.xlu0 %596  ;;  %v806_v48 = vsel %vm794_vm11, %v753_v33, %v805_v34  ;;  %v75_v33 = vld [vmem:[#allocation7 + $0x30] sm:$0xff]  ;;  %v842_v34 = vsub.s32 4, %v2121_v11 }
 0x259   :  { %v558_v19 = vpop.xlane.xlu1 %557  ;;  %v770_v9 = vrot.slane %v597_v60, %v2312_v47  ;;  %v807_v60 = vsel %vm796_vm12, %v762_v55, %v806_v48 }
 0x25a   :  { %v712_v42 = vrot.slane %v558_v19, %v2309_v46  ;;  %v843_v35 = vrot.slane %v2129_v15, %v842_v34 }
 0x25b   :  { %v771_v51 = vsel %vm653_vm8, %v770_v9, %v766_v40  ;;  %v892_v9 = vpack.c.bf16 %v75_v33, %v74_v31 }
 0x25c   :  { %v603_v21 = vpop.xlane.xlu0 %602  ;;  %v808_v62 = vsel %vm798_vm13, %v771_v51, %v807_v60 }
 0x25d   :  { %v779_v38 = vrot.slane %v603_v21, %v2312_v47  ;;  %v606_v50 = vpop.xlane.xlu1 %605 }
 0x25e   :  { %v784_v54 = vrot.slane %v606_v50, %v2309_v46 }
 0x25f   :  { %v780_v37 = vsel %vm653_vm8, %v779_v38, %v775_v41  ;;  %v895_v41 = vsub.s32 1, %v2121_v11 }
 0x260   :  { %v561_v39 = vpop.xlane.xlu0 %560  ;;  %v809_v1 = vsel %vm800_vm14, %v780_v37, %v808_v62 }
 0x261   :  { %v716_v43 = vrot.slane %v561_v39, %v2312_v47  ;;  %v896_v50 = vrot.slane %v2129_v15, %v895_v41 }
 0x263   :  { %v717_v49 = vsel %vm653_vm8, %v716_v43, %v712_v42 }
 0x264   :  { %v609_v56 = vpop.xlane.xlu0 %608  ;;  %v803_v57 = vsel %vm802_vm15, %v717_v49, %v801_v52 }
 0x265   :  { %v788_v58 = vrot.slane %v609_v56, %v2312_v47  ;;  %v813_v59 = vsel %vm67_vm1, %v803_v57, -1e+30 }
 0x266   :  { %v816_v61 = vsel %vm815_vm2, %v813_v59, -inf }
 0x267   :  { %817 = vmax.xlane.f32.xlu1 %v816_v61  ;;  %v789_v63 = vsel %vm653_vm8, %v788_v58, %v784_v54 }
 0x268   :  { %v810_v2 = vsel %vm802_vm15, %v789_v63, %v809_v1 }
 0x269   :  { %v814_v3 = vsel %vm2683_vm3, %v810_v2, -1e+30 }
 0x26a   :  { %v819_v4 = vsel %vm815_vm2, %v814_v3, -inf }
 0x26b   :  { %820 = vmax.xlane.f32.xlu0 %v819_v4 }
 0x2f4   :  { %v818_v5 = vpop.xlane.xlu1 %817 }
 0x2f5   :  { %v822_v6 = vsub.f32 %v813_v59, %v818_v5 }
 0x2f7   :  { %v824_v7 = vmul.f32 1.442695, %v822_v6 }
 0x2f8   :  { %v821_v8 = vpop.xlane.xlu0 %820 }
 0x2f9   :  { %1906 = vpow2.f32 %v824_v7  ;;  %v823_v23 = vsub.f32 %v814_v3, %v821_v8 }
 0x2fb   :  { %v826_v12 = vmul.f32 1.442695, %v823_v23 }
 0x2fd   :  { %1908 = vpow2.f32 %v826_v12 }
 0x303   :  { %v1907_v13 = vpop.eup %1906 }
 0x304   :  { %v828_v16 = vsel %vm815_vm2, %v1907_v13, 0.0 }
 0x305   :  { %829 = vadd.xlane.f32.xlu1 %v828_v16 }
 0x307   :  { %v1909_v17 = vpop.eup %1908 }
 0x308   :  { %v831_v19 = vsel %vm815_vm2, %v1909_v17, 0.0 }
 0x309   :  { %832 = vadd.xlane.f32.xlu0 %v831_v19 }
 0x392   :  { %v830_v21 = vpop.xlane.xlu1 %829 }
 0x393   :  { %1910 = vrcp.f32 %v830_v21 }
 0x396   :  { %v833_v22 = vpop.xlane.xlu0 %832 }
 0x397   :  { %1912 = vrcp.f32 %v833_v22 }
 0x39d   :  { %v1911_v24 = vpop.eup %1910 }
 0x39e   :  { %v836_v26 = vmul.f32 %v1911_v24, %v1907_v13 }
 0x3a1   :  { %v1913_v25 = vpop.eup %1912 }
 0x3a2   :  { %v837_v27 = vmul.f32 %v1913_v25, %v1909_v17 }
 0x3a4   :  { %v838_v28 = vpack.c.bf16 %v837_v27, %v836_v26 }
 0x3a6   :  { %1855 = vmatmul.mubr.msk.bf16.vlgmr.msra.gmra.mrb[0].mxu1 %vm815_vm2, %v838_v28 }
 0x3a7   :  { %1862 = vmatprep.mubr.msk.bf16.mxu1 %vm2682_vm0, %v2022_v0  ;;  %1859 = vmatpush3.bf16.msra.mxu1 %v891_v32 }
 0x3a8   :  { %1860 = vmatprep.subr.bf16.mxu1 %v2022_v0 }
 0x3ab   :  { %1861 = vmatpush3.bf16.msra.mxu1 %v892_v9 }
 0x3ac   :  { %1872 = vmatprep.subr.bf16.mxu1 %v2022_v0 }
 0x479   :  { %v881_v36 = vpop.f32.mrb[0].mxu1 }
 0x47a   :  { %v882_v38 = vadd.f32 %v881_v36, %v843_v35  ;;  %v1856_v39 = vpop.f32.mrb[1].mxu1 }
 0x47b   :  { %v884_v40 = vpop.f32.mrb[2].mxu1 }
 0x47c   :  { %v885_v42 = vadd.f32 %v884_v40, %v843_v35  ;;  %v1857_v43 = vpop.f32.mrb[3].mxu1  ;;  %v888_v44 = vmax.f32 %v882_v38, 0.0  ;;  %v1283_v40 = vsub.s32 3, %v2121_v11 }
 0x47e   :  { %v889_v45 = vmax.f32 %v885_v42, 0.0 }
 0x480   :  { %v890_v48 = vpack.c.bf16 %v889_v45, %v888_v44 }
 0x482   :  { %1863 = vmatmul.mubr.msk.bf16.vlgmr.msra.gmra.mrb[4].mxu1 %vm513_vm4, %v890_v48 }
 0x483   :  { %1874 = vmatprep.mubr.msk.bf16.mxu1 %vm2682_vm0, %v2022_v0 }
 0x555   :  { %v934_v10 = vpop.f32.mrb[4].mxu1 }
 0x556   :  { %v2415_v51 = vadd.f32 %v934_v10, %v896_v50  ;;  %v1864_v49 = vpop.f32.mrb[5].mxu1 }
 0x557   :  { %v937_v52 = vpop.f32.mrb[6].mxu1 }
 0x558   :  { %v2417_v55 = vadd.f32 %v937_v52, %v896_v50  ;;  %v1865_v37 = vpop.f32.mrb[7].mxu1  ;;  %v950_v56 = vrot.slane %v2415_v51, %v2134_v18  ;;  %v943_v57 = vcombine.high %v2415_v51, %v2415_v51 }
 0x55a   :  { %v1630_v54 = vpack.c.bf16 %v2417_v55, %v2415_v51  ;;  %v966_v58 = vrot.slane %v950_v56, %v2134_v18  ;;  %v958_v15 = vcombine.high %v950_v56, %v950_v56  ;;  %v999_v59 = vrot.slane %v2417_v55, %v2134_v18 }
 0x55b   :  { %v957_v3 = vrot.slane %v943_v57, %v2134_v18  ;;  %v992_v6 = vcombine.high %v2417_v55, %v2417_v55 }
 0x55c   :  { %1867 = vmatpush3.bf16.msra.mxu0 %v1630_v54  ;;  %v1044_v60 = vrot.slane %v966_v58, %v2124_v14  ;;  %v980_v61 = vrot.slane %v958_v15, %v2134_v18  ;;  %v1015_v62 = vrot.slane %v999_v59, %v2134_v18  ;;  %v1007_v63 = vcombine.high %v999_v59, %v999_v59 }
 0x55d   :  { %v988_v2 = vcombine.high %v966_v58, %v966_v58  ;;  %v973_v8 = vrot.slane %v957_v3, %v2134_v18  ;;  %v1006_v13 = vrot.slane %v992_v6, %v2134_v18  ;;  %v959_v19 = vcombine.high %v957_v3, %v957_v3 }
 0x55e   :  { %1105 = vrot.lane.b32.xlu1 %v1044_v60, %s2025_s30  ;;  %v1048_v1 = vrot.slane %v980_v61, %v2124_v14  ;;  %v1076_v4 = vrot.slane %v1015_v62, %v2124_v14  ;;  %v1029_v5 = vrot.slane %v1007_v63, %v2134_v18  ;;  %v1037_v12 = vcombine.high %v1015_v62, %v1015_v62 }
 0x55f   :  { %v1052_v7 = vrot.slane %v988_v2, %v2124_v14  ;;  %v1060_v16 = vrot.slane %v973_v8, %v2124_v14  ;;  %v990_v17 = vcombine.high %v980_v61, %v980_v61  ;;  %v1022_v22 = vrot.slane %v1006_v13, %v2134_v18 }
 0x560   :  { %1107 = vrot.lane.b32.xlu0 %v1048_v1, %s2025_s30  ;;  %v1080_v23 = vrot.slane %v1029_v5, %v2124_v14  ;;  %v1084_v21 = vrot.slane %v1037_v12, %v2124_v14  ;;  %v987_v25 = vrot.slane %v959_v19, %v2134_v18  ;;  %v1039_v27 = vcombine.high %v1029_v5, %v1029_v5 }
 0x561   :  { %v1056_v24 = vrot.slane %v990_v17, %v2124_v14  ;;  %v1092_v26 = vrot.slane %v1022_v22, %v2124_v14  ;;  %v1008_v28 = vcombine.high %v1006_v13, %v1006_v13  ;;  %v989_v30 = vcombine.high %v973_v8, %v973_v8 }
 0x562   :  { %1121 = vrot.lane.b32.xlu1 %v1076_v4, %s2025_s30  ;;  %v1064_v29 = vrot.slane %v987_v25, %v2124_v14  ;;  %v1088_v31 = vrot.slane %v1039_v27, %v2124_v14  ;;  %v991_v9 = vcombine.high %v987_v25, %v987_v25  ;;  %v1038_v35 = vcombine.high %v1022_v22, %v1022_v22 }
 0x563   :  { %v1036_v32 = vrot.slane %v1008_v28, %v2134_v18  ;;  %v1068_v33 = vrot.slane %v989_v30, %v2124_v14 }
 0x564   :  { %1109 = vrot.lane.b32.xlu0 %v1052_v7, %s2025_s30  ;;  %v1072_v36 = vrot.slane %v991_v9, %v2124_v14  ;;  %v1100_v38 = vrot.slane %v1038_v35, %v2124_v14 }
 0x565   :  { %v1096_v34 = vrot.slane %v1036_v32, %v2124_v14  ;;  %v1040_v39 = vcombine.high %v1036_v32, %v1036_v32 }
 0x566   :  { %1123 = vrot.lane.b32.xlu1 %v1080_v23, %s2025_s30 }
 0x567   :  { %v1104_v18 = vrot.slane %v1040_v39, %v2124_v14  ;;  %v2479_v14 = vld [vmem:[%s2680_s4] sm:$0xff] }
 0x568   :  { %1113 = vrot.lane.b32.xlu0 %v1060_v16, %s2025_s30  ;;  %v2482_v49 = vrot.slane %v2479_v14, %v1283_v40 }
 0x56a   :  { %1125 = vrot.lane.b32.xlu1 %v1084_v21, %s2025_s30 }
 0x56c   :  { %1111 = vrot.lane.b32.xlu0 %v1056_v24, %s2025_s30 }
 0x56e   :  { %1129 = vrot.lane.b32.xlu1 %v1092_v26, %s2025_s30 }
 0x570   :  { %1115 = vrot.lane.b32.xlu0 %v1064_v29, %s2025_s30 }
 0x572   :  { %1127 = vrot.lane.b32.xlu1 %v1088_v31, %s2025_s30 }
 0x574   :  { %1117 = vrot.lane.b32.xlu0 %v1068_v33, %s2025_s30 }
 0x576   :  { %1131 = vrot.lane.b32.xlu1 %v1096_v34, %s2025_s30 }
 0x578   :  { %1119 = vrot.lane.b32.xlu0 %v1072_v36, %s2025_s30 }
 0x57a   :  { %1133 = vrot.lane.b32.xlu1 %v1100_v38, %s2025_s30 }
 0x57e   :  { %1135 = vrot.lane.b32.xlu1 %v1104_v18, %s2025_s30 }
 0x5d0   :  { %v1106_v42 = vpop.permute.xlu1 %1105 }
 0x5d1   :  { %v1153_v43 = vadd.f32 %v1106_v42, %v2415_v51  ;;  %v1154_v44 = vadd.f32 %v1106_v42, %v2417_v55 }
 0x5d2   :  { %v1108_v45 = vpop.permute.xlu0 %1107 }
 0x5d3   :  { %v1217_v48 = vmul.f32 0.2, %v1153_v43  ;;  %v1218_v41 = vmul.f32 0.2, %v1154_v44  ;;  %v1155_v50 = vadd.f32 %v1108_v45, %v2415_v51  ;;  %v1156_v10 = vadd.f32 %v1108_v45, %v2417_v55 }
 0x5d4   :  { %v1122_v52 = vpop.permute.xlu1 %1121  ;;  %vm1185_vm5 = vcmp.gt.f32.partialorder %v1153_v43, 0.0  ;;  %vm1186_vm6 = vcmp.gt.f32.partialorder %v1154_v44, 0.0 }
 0x5d5   :  { %v1219_v37 = vmul.f32 0.2, %v1155_v50  ;;  %v1169_v56 = vadd.f32 %v1122_v52, %v2415_v51  ;;  %v1249_v54 = vsel %vm1185_vm5, %v1153_v43, %v1217_v48  ;;  %v1250_v58 = vsel %vm1186_vm6, %v1154_v44, %v1218_v41 }
 0x5d6   :  { %v1110_v57 = vpop.permute.xlu0 %1109  ;;  %vm1187_vm7 = vcmp.gt.f32.partialorder %v1155_v50, 0.0  ;;  %v1220_v15 = vmul.f32 0.2, %v1156_v10  ;;  %v1170_v59 = vadd.f32 %v1122_v52, %v2417_v55  ;;  %v1285_v63 = vmul.f32 %v2482_v49, %v1249_v54 }
 0x5d7   :  { %v1233_v60 = vmul.f32 0.2, %v1169_v56  ;;  %v1157_v61 = vadd.f32 %v1110_v57, %v2415_v51  ;;  %v1286_v1 = vmul.f32 %v2482_v49, %v1250_v58  ;;  %v1251_v2 = vsel %vm1187_vm7, %v1155_v50, %v1219_v37 }
 0x5d8   :  { %v1124_v62 = vpop.permute.xlu1 %1123  ;;  %vm1201_vm0 = vcmp.gt.f32.partialorder %v1169_v56, 0.0  ;;  %vm1188_vm3 = vcmp.gt.f32.partialorder %v1156_v10, 0.0  ;;  %v1317_v4 = vsel %vm513_vm4, %v1285_v63, 0.0  ;;  %v1287_v7 = vmul.f32 %v2482_v49, %v1251_v2 }
 0x5d9   :  { %v1221_v3 = vmul.f32 0.2, %v1157_v61  ;;  %v1320_v5 = vsel %vm513_vm4, %v1286_v1, 0.0  ;;  %v1265_v8 = vsel %vm1201_vm0, %v1169_v56, %v1233_v60  ;;  %v1158_v23 = vadd.f32 %v1110_v57, %v2417_v55  ;;  %1318 = vadd.xlane.f32.xlu0 %v1317_v4 }
 0x5da   :  { %v1114_v6 = vpop.permute.xlu0 %1113  ;;  %1321 = vadd.xlane.f32.xlu1 %v1320_v5  ;;  %v1234_v13 = vmul.f32 0.2, %v1170_v59  ;;  %v1301_v16 = vmul.f32 %v2482_v49, %v1265_v8  ;;  %v1252_v17 = vsel %vm1188_vm3, %v1156_v10, %v1220_v15  ;;  %vm1189_vm5 = vcmp.gt.f32.partialorder %v1157_v61, 0.0 }
 0x5db   :  { %v1161_v12 = vadd.f32 %v1114_v6, %v2415_v51  ;;  %v1171_v19 = vadd.f32 %v1124_v62, %v2415_v51  ;;  %v1323_v22 = vsel %vm513_vm4, %v1287_v7, 0.0  ;;  %v1288_v26 = vmul.f32 %v2482_v49, %v1252_v17 }
 0x5dc   :  { %v1126_v24 = vpop.permute.xlu1 %1125  ;;  %v1365_v25 = vsel %vm513_vm4, %v1301_v16, 0.0  ;;  %v1253_v27 = vsel %vm1189_vm5, %v1157_v61, %v1221_v3  ;;  %vm1202_vm0 = vcmp.gt.f32.partialorder %v1170_v59, 0.0  ;;  %v1222_v28 = vmul.f32 0.2, %v1158_v23 }
 0x5dd   :  { %v1225_v21 = vmul.f32 0.2, %v1161_v12  ;;  %1324 = vadd.xlane.f32.xlu0 %v1323_v22  ;;  %v1162_v29 = vadd.f32 %v1114_v6, %v2417_v55  ;;  %v1289_v31 = vmul.f32 %v2482_v49, %v1253_v27  ;;  %v1266_v32 = vsel %vm1202_vm0, %v1170_v59, %v1234_v13 }
 0x5de   :  { %1366 = vadd.xlane.f32.xlu1 %v1365_v25  ;;  %v1112_v30 = vpop.permute.xlu0 %1111  ;;  %vm1193_vm3 = vcmp.gt.f32.partialorder %v1161_v12, 0.0  ;;  %v1235_v33 = vmul.f32 0.2, %v1171_v19  ;;  %v1173_v9 = vadd.f32 %v1126_v24, %v2415_v51  ;;  %v1326_v34 = vsel %vm513_vm4, %v1288_v26, 0.0 }
 0x5df   :  { %v1329_v35 = vsel %vm513_vm4, %v1289_v31, 0.0  ;;  %v1302_v36 = vmul.f32 %v2482_v49, %v1266_v32  ;;  %v1257_v38 = vsel %vm1193_vm3, %v1161_v12, %v1225_v21  ;;  %vm1190_vm6 = vcmp.gt.f32.partialorder %v1158_v23, 0.0 }
 0x5e0   :  { %v1172_v39 = vadd.f32 %v1124_v62, %v2417_v55  ;;  %v1226_v18 = vmul.f32 0.2, %v1162_v29  ;;  %v1130_v40 = vpop.permute.xlu1 %1129  ;;  %v1293_v42 = vmul.f32 %v2482_v49, %v1257_v38  ;;  %v1254_v43 = vsel %vm1190_vm6, %v1158_v23, %v1222_v28 }
 0x5e1   :  { %1327 = vadd.xlane.f32.xlu0 %v1326_v34  ;;  %vm1203_vm7 = vcmp.gt.f32.partialorder %v1171_v19, 0.0  ;;  %v1237_v44 = vmul.f32 0.2, %v1173_v9  ;;  %v1159_v45 = vadd.f32 %v1112_v30, %v2415_v51  ;;  %v1368_v48 = vsel %vm513_vm4, %v1302_v36, 0.0 }
 0x5e2   :  { %1330 = vadd.xlane.f32.xlu1 %v1329_v35  ;;  %v1116_v41 = vpop.permute.xlu0 %1115  ;;  %v1341_v50 = vsel %vm513_vm4, %v1293_v42, 0.0  ;;  %v1290_v10 = vmul.f32 %v2482_v49, %v1254_v43  ;;  %v1267_v52 = vsel %vm1203_vm7, %v1171_v19, %v1235_v33  ;;  %vm1194_vm5 = vcmp.gt.f32.partialorder %v1162_v29, 0.0 }
 0x5e3   :  { %v1174_v37 = vadd.f32 %v1126_v24, %v2417_v55  ;;  %v1177_v56 = vadd.f32 %v1130_v40, %v2415_v51  ;;  %v1236_v57 = vmul.f32 0.2, %v1172_v39  ;;  %v1303_v54 = vmul.f32 %v2482_v49, %v1267_v52 }
 0x5e4   :  { %v1258_v58 = vsel %vm1194_vm5, %v1162_v29, %v1226_v18  ;;  %vm1205_vm0 = vcmp.gt.f32.partialorder %v1173_v9, 0.0  ;;  %v1223_v15 = vmul.f32 0.2, %v1159_v45  ;;  %v1332_v59 = vsel %vm513_vm4, %v1290_v10, 0.0  ;;  %v1128_v4 = vpop.permute.xlu1 %1127 }
 0x5e5   :  { %1369 = vadd.xlane.f32.xlu0 %v1368_v48  ;;  %v1371_v60 = vsel %vm513_vm4, %v1303_v54, 0.0  ;;  %v1294_v61 = vmul.f32 %v2482_v49, %v1258_v58  ;;  %v1269_v62 = vsel %vm1205_vm0, %v1173_v9, %v1237_v44  ;;  %vm1204_vm3 = vcmp.gt.f32.partialorder %v1172_v39, 0.0 }
 0x5e6   :  { %1342 = vadd.xlane.f32.xlu1 %v1341_v50  ;;  %v1238_v63 = vmul.f32 0.2, %v1174_v37  ;;  %v1160_v1 = vadd.f32 %v1112_v30, %v2417_v55  ;;  %v1241_v2 = vmul.f32 0.2, %v1177_v56  ;;  %v1163_v3 = vadd.f32 %v1116_v41, %v2415_v51  ;;  %v1118_v5 = vpop.permute.xlu0 %1117 }
 0x5e7   :  { %v1305_v6 = vmul.f32 %v2482_v49, %v1269_v62  ;;  %v1268_v7 = vsel %vm1204_vm3, %v1172_v39, %v1236_v57  ;;  %vm1191_vm6 = vcmp.gt.f32.partialorder %v1159_v45, 0.0  ;;  %v1178_v8 = vadd.f32 %v1130_v40, %v2417_v55 }
 0x5e8   :  { %v1344_v23 = vsel %vm513_vm4, %v1294_v61, 0.0  ;;  %v1304_v13 = vmul.f32 %v2482_v49, %v1268_v7  ;;  %v1255_v16 = vsel %vm1191_vm6, %v1159_v45, %v1223_v15  ;;  %v1165_v17 = vadd.f32 %v1118_v5, %v2415_v51  ;;  %v1132_v29 = vpop.permute.xlu1 %1131 }
 0x5e9   :  { %1333 = vadd.xlane.f32.xlu0 %v1332_v59  ;;  %v1377_v12 = vsel %vm513_vm4, %v1305_v6, 0.0  ;;  %v1291_v19 = vmul.f32 %v2482_v49, %v1255_v16  ;;  %vm1206_vm7 = vcmp.gt.f32.partialorder %v1174_v37, 0.0  ;;  %vm1209_vm5 = vcmp.gt.f32.partialorder %v1177_v56, 0.0 }
 0x5ea   :  { %1372 = vadd.xlane.f32.xlu1 %v1371_v60  ;;  %v1224_v21 = vmul.f32 0.2, %v1160_v1  ;;  %v1227_v22 = vmul.f32 0.2, %v1163_v3  ;;  %v1270_v24 = vsel %vm1206_vm7, %v1174_v37, %v1238_v63  ;;  %v1273_v25 = vsel %vm1209_vm5, %v1177_v56, %v1241_v2  ;;  %v1120_v60 = vpop.permute.xlu0 %1119 }
 0x5eb   :  { %v1164_v26 = vadd.f32 %v1116_v41, %v2417_v55  ;;  %v1374_v27 = vsel %vm513_vm4, %v1304_v13, 0.0  ;;  %v1335_v28 = vsel %vm513_vm4, %v1291_v19, 0.0  ;;  %v1306_v30 = vmul.f32 %v2482_v49, %v1270_v24 }
 0x5ec   :  { %v1309_v31 = vmul.f32 %v2482_v49, %v1273_v25  ;;  %vm1192_vm0 = vcmp.gt.f32.partialorder %v1160_v1, 0.0  ;;  %vm1195_vm3 = vcmp.gt.f32.partialorder %v1163_v3, 0.0  ;;  %v1242_v32 = vmul.f32 0.2, %v1178_v8  ;;  %v1134_v41 = vpop.permute.xlu1 %1133 }
 0x5ed   :  { %1345 = vadd.xlane.f32.xlu0 %v1344_v23  ;;  %v1175_v33 = vadd.f32 %v1128_v4, %v2415_v51  ;;  %v1229_v9 = vmul.f32 0.2, %v1165_v17  ;;  %v1256_v34 = vsel %vm1192_vm0, %v1160_v1, %v1224_v21  ;;  %v1259_v35 = vsel %vm1195_vm3, %v1163_v3, %v1227_v22 }
 0x5ee   :  { %1378 = vadd.xlane.f32.xlu1 %v1377_v12  ;;  %vm1210_vm6 = vcmp.gt.f32.partialorder %v1178_v8, 0.0  ;;  %v1228_v36 = vmul.f32 0.2, %v1164_v26  ;;  %v1166_v38 = vadd.f32 %v1118_v5, %v2417_v55  ;;  %vm1197_vm7 = vcmp.gt.f32.partialorder %v1165_v17, 0.0 }
 0x5ef   :  { %v1380_v39 = vsel %vm513_vm4, %v1306_v30, 0.0  ;;  %v1389_v18 = vsel %vm513_vm4, %v1309_v31, 0.0  ;;  %v1292_v40 = vmul.f32 %v2482_v49, %v1256_v34  ;;  %v1295_v42 = vmul.f32 %v2482_v49, %v1259_v35 }
 0x5f0   :  { %v1239_v43 = vmul.f32 0.2, %v1175_v33  ;;  %v1179_v44 = vadd.f32 %v1132_v29, %v2415_v51  ;;  %v1274_v45 = vsel %vm1210_vm6, %v1178_v8, %v1242_v32  ;;  %v1261_v48 = vsel %vm1197_vm7, %v1165_v17, %v1229_v9  ;;  %v1136_v8 = vpop.permute.xlu1 %1135 }
 0x5f1   :  { %1375 = vadd.xlane.f32.xlu0 %v1374_v27  ;;  %vm1196_vm5 = vcmp.gt.f32.partialorder %v1164_v26, 0.0  ;;  %vm1207_vm0 = vcmp.gt.f32.partialorder %v1175_v33, 0.0  ;;  %v1176_v50 = vadd.f32 %v1128_v4, %v2417_v55  ;;  %v1230_v10 = vmul.f32 0.2, %v1166_v38 }
 0x5f2   :  { %1336 = vadd.xlane.f32.xlu1 %v1335_v28  ;;  %v1338_v52 = vsel %vm513_vm4, %v1292_v40, 0.0  ;;  %v1347_v37 = vsel %vm513_vm4, %v1295_v42, 0.0  ;;  %v1310_v56 = vmul.f32 %v2482_v49, %v1274_v45  ;;  %v1297_v57 = vmul.f32 %v2482_v49, %v1261_v48 }
 0x5f3   :  { %v1243_v54 = vmul.f32 0.2, %v1179_v44  ;;  %v1181_v58 = vadd.f32 %v1134_v41, %v2415_v51  ;;  %v1260_v15 = vsel %vm1196_vm5, %v1164_v26, %v1228_v36  ;;  %v1271_v59 = vsel %vm1207_vm0, %v1175_v33, %v1239_v43 }
 0x5f4   :  { %vm1198_vm3 = vcmp.gt.f32.partialorder %v1166_v38, 0.0  ;;  %vm1211_vm6 = vcmp.gt.f32.partialorder %v1179_v44, 0.0  ;;  %v1240_v61 = vmul.f32 0.2, %v1176_v50  ;;  %v1180_v62 = vadd.f32 %v1132_v29, %v2417_v55 }
 0x5f5   :  { %1381 = vadd.xlane.f32.xlu0 %v1380_v39  ;;  %v1392_v63 = vsel %vm513_vm4, %v1310_v56, 0.0  ;;  %v1353_v1 = vsel %vm513_vm4, %v1297_v57, 0.0  ;;  %v1296_v2 = vmul.f32 %v2482_v49, %v1260_v15  ;;  %v1307_v3 = vmul.f32 %v2482_v49, %v1271_v59 }
 0x5f6   :  { %1390 = vadd.xlane.f32.xlu1 %v1389_v18  ;;  %v1167_v4 = vadd.f32 %v1120_v60, %v2415_v51  ;;  %v1245_v5 = vmul.f32 0.2, %v1181_v58  ;;  %v1262_v6 = vsel %vm1198_vm3, %v1166_v38, %v1230_v10  ;;  %v1275_v7 = vsel %vm1211_vm6, %v1179_v44, %v1243_v54 }
 0x5f7   :  { %vm1208_vm7 = vcmp.gt.f32.partialorder %v1176_v50, 0.0  ;;  %vm1213_vm5 = vcmp.gt.f32.partialorder %v1181_v58, 0.0  ;;  %v1244_v23 = vmul.f32 0.2, %v1180_v62  ;;  %v1182_v12 = vadd.f32 %v1134_v41, %v2417_v55 }
 0x5f8   :  { %v1350_v13 = vsel %vm513_vm4, %v1296_v2, 0.0  ;;  %v1383_v16 = vsel %vm513_vm4, %v1307_v3, 0.0  ;;  %v1298_v17 = vmul.f32 %v2482_v49, %v1262_v6  ;;  %v1311_v19 = vmul.f32 %v2482_v49, %v1275_v7 }
 0x5f9   :  { %1339 = vadd.xlane.f32.xlu0 %v1338_v52  ;;  %v1231_v21 = vmul.f32 0.2, %v1167_v4  ;;  %v1183_v22 = vadd.f32 %v1136_v8, %v2415_v51  ;;  %v1272_v24 = vsel %vm1208_vm7, %v1176_v50, %v1240_v61  ;;  %v1277_v25 = vsel %vm1213_vm5, %v1181_v58, %v1245_v5 }
 0x5fa   :  { %1348 = vadd.xlane.f32.xlu1 %v1347_v37  ;;  %vm1212_vm0 = vcmp.gt.f32.partialorder %v1180_v62, 0.0  ;;  %vm1199_vm3 = vcmp.gt.f32.partialorder %v1167_v4, 0.0  ;;  %v1168_v26 = vadd.f32 %v1120_v60, %v2417_v55  ;;  %v1356_v27 = vsel %vm513_vm4, %v1298_v17, 0.0 }
 0x5fb   :  { %v1395_v28 = vsel %vm513_vm4, %v1311_v19, 0.0  ;;  %v1308_v29 = vmul.f32 %v2482_v49, %v1272_v24  ;;  %v1313_v30 = vmul.f32 %v2482_v49, %v1277_v25  ;;  %v1246_v31 = vmul.f32 0.2, %v1182_v12 }
 0x5fc   :  { %v1247_v32 = vmul.f32 0.2, %v1183_v22  ;;  %v1276_v51 = vsel %vm1212_vm0, %v1180_v62, %v1244_v23  ;;  %v1263_v33 = vsel %vm1199_vm3, %v1167_v4, %v1231_v21  ;;  %vm1214_vm6 = vcmp.gt.f32.partialorder %v1182_v12, 0.0 }
 0x5fd   :  { %1393 = vadd.xlane.f32.xlu0 %v1392_v63  ;;  %vm1215_vm7 = vcmp.gt.f32.partialorder %v1183_v22, 0.0  ;;  %v1386_v9 = vsel %vm513_vm4, %v1308_v29, 0.0  ;;  %v1401_v34 = vsel %vm513_vm4, %v1313_v30, 0.0  ;;  %v1312_v35 = vmul.f32 %v2482_v49, %v1276_v51 }
 0x5fe   :  { %1354 = vadd.xlane.f32.xlu1 %v1353_v1  ;;  %v1299_v36 = vmul.f32 %v2482_v49, %v1263_v33  ;;  %v1232_v38 = vmul.f32 0.2, %v1168_v26  ;;  %v1184_v39 = vadd.f32 %v1136_v8, %v2417_v55  ;;  %v1278_v18 = vsel %vm1214_vm6, %v1182_v12, %v1246_v31 }
 0x5ff   :  { %v1279_v40 = vsel %vm1215_vm7, %v1183_v22, %v1247_v32  ;;  %vm1200_vm5 = vcmp.gt.f32.partialorder %v1168_v26, 0.0  ;;  %v1398_v42 = vsel %vm513_vm4, %v1312_v35, 0.0  ;;  %v1314_v44 = vmul.f32 %v2482_v49, %v1278_v18 }
 0x600   :  { %v1359_v43 = vsel %vm513_vm4, %v1299_v36, 0.0  ;;  %v1315_v45 = vmul.f32 %v2482_v49, %v1279_v40  ;;  %v1248_v48 = vmul.f32 0.2, %v1184_v39  ;;  %v1264_v41 = vsel %vm1200_vm5, %v1168_v26, %v1232_v38 }
 0x601   :  { %1351 = vadd.xlane.f32.xlu0 %v1350_v13  ;;  %vm1216_vm0 = vcmp.gt.f32.partialorder %v1184_v39, 0.0  ;;  %v1404_v55 = vsel %vm513_vm4, %v1314_v44, 0.0  ;;  %v1300_v10 = vmul.f32 %v2482_v49, %v1264_v41 }
 0x602   :  { %1384 = vadd.xlane.f32.xlu1 %v1383_v16  ;;  %v1407_v50 = vsel %vm513_vm4, %v1315_v45, 0.0  ;;  %v1280_v52 = vsel %vm1216_vm0, %v1184_v39, %v1248_v48 }
 0x603   :  { %v1362_v37 = vsel %vm513_vm4, %v1300_v10, 0.0  ;;  %v1316_v56 = vmul.f32 %v2482_v49, %v1280_v52 }
 0x605   :  { %1357 = vadd.xlane.f32.xlu0 %v1356_v27  ;;  %v1410_v57 = vsel %vm513_vm4, %v1316_v56, 0.0 }
 0x606   :  { %1396 = vadd.xlane.f32.xlu1 %v1395_v28 }
 0x609   :  { %1387 = vadd.xlane.f32.xlu0 %v1386_v9 }
 0x60a   :  { %1402 = vadd.xlane.f32.xlu1 %v1401_v34 }
 0x60d   :  { %1399 = vadd.xlane.f32.xlu0 %v1398_v42 }
 0x60e   :  { %1360 = vadd.xlane.f32.xlu1 %v1359_v43 }
 0x611   :  { %1405 = vadd.xlane.f32.xlu0 %v1404_v55 }
 0x612   :  { %1408 = vadd.xlane.f32.xlu1 %v1407_v50 }
 0x615   :  { %1363 = vadd.xlane.f32.xlu0 %v1362_v37 }
 0x619   :  { %1411 = vadd.xlane.f32.xlu0 %v1410_v57 }
 0x666   :  { %v1319_v54 = vpop.xlane.xlu0 %1318 }
 0x667   :  { %v1322_v58 = vpop.xlane.xlu1 %1321  ;;  %v1448_v22 = vrot.slane %v1319_v54, %v2309_v46 }
 0x668   :  { %v1452_v24 = vrot.slane %v1322_v58, %v2312_v47 }
 0x66a   :  { %v1325_v15 = vpop.xlane.xlu0 %1324  ;;  %v1453_v31 = vsel %vm653_vm8, %v1452_v24, %v1448_v22 }
 0x66b   :  { %v1367_v59 = vpop.xlane.xlu1 %1366  ;;  %v1457_v29 = vrot.slane %v1325_v15, %v2309_v46 }
 0x66c   :  { %v1520_v9 = vrot.slane %v1367_v59, %v2309_v46 }
 0x66e   :  { %v1328_v60 = vpop.xlane.xlu0 %1327 }
 0x66f   :  { %v1331_v61 = vpop.xlane.xlu1 %1330  ;;  %v1461_v26 = vrot.slane %v1328_v60, %v2312_v47 }
 0x670   :  { %v1466_v32 = vrot.slane %v1331_v61, %v2309_v46 }
 0x671   :  { %v1462_v34 = vsel %vm653_vm8, %v1461_v26, %v1457_v29 }
 0x672   :  { %v1370_v62 = vpop.xlane.xlu0 %1369  ;;  %v1589_v48 = vsel %vm790_vm9, %v1462_v34, %v1453_v31 }
 0x673   :  { %v1343_v63 = vpop.xlane.xlu1 %1342  ;;  %v1524_v38 = vrot.slane %v1370_v62, %v2312_v47 }
 0x674   :  { %v1484_v41 = vrot.slane %v1343_v63, %v2309_v46 }
 0x675   :  { %v1525_v58 = vsel %vm653_vm8, %v1524_v38, %v1520_v9 }
 0x676   :  { %v1334_v1 = vpop.xlane.xlu0 %1333 }
 0x677   :  { %v1373_v2 = vpop.xlane.xlu1 %1372  ;;  %v1470_v27 = vrot.slane %v1334_v1, %v2312_v47 }
 0x678   :  { %v1529_v18 = vrot.slane %v1373_v2, %v2309_v46 }
 0x679   :  { %v1471_v39 = vsel %vm653_vm8, %v1470_v27, %v1466_v32 }
 0x67a   :  { %v1346_v3 = vpop.xlane.xlu0 %1345  ;;  %v1590_v37 = vsel %vm792_vm10, %v1471_v39, %v1589_v48 }
 0x67b   :  { %v1379_v4 = vpop.xlane.xlu1 %1378  ;;  %v1488_v40 = vrot.slane %v1346_v3, %v2312_v47 }
 0x67c   :  { %v1538_v42 = vrot.slane %v1379_v4, %v2309_v46 }
 0x67d   :  { %v1489_v15 = vsel %vm653_vm8, %v1488_v40, %v1484_v41 }
 0x67e   :  { %v1376_v5 = vpop.xlane.xlu0 %1375 }
 0x67f   :  { %v1337_v6 = vpop.xlane.xlu1 %1336  ;;  %v1533_v51 = vrot.slane %v1376_v5, %v2312_v47 }
 0x680   :  { %v1475_v35 = vrot.slane %v1337_v6, %v2309_v46 }
 0x681   :  { %v1534_v55 = vsel %vm653_vm8, %v1533_v51, %v1529_v18 }
 0x682   :  { %v1382_v7 = vpop.xlane.xlu0 %1381  ;;  %v1596_v61 = vsel %vm790_vm9, %v1534_v55, %v1525_v58  ;;  %vm2684_vm9 = vcmp.gt.f32.partialorder %v2382_v53, 0.5  ;;  %v1633_v58 = vsub.s32 5, %v2121_v11 }
 0x683   :  { %v2576_v49 = vpop.xlane.xlu1 %1390  ;;  %v1542_v36 = vrot.slane %v1382_v7, %v2312_v47 }
 0x685   :  { %v1543_v56 = vsel %vm653_vm8, %v1542_v36, %v1538_v42 }
 0x686   :  { %v1340_v8 = vpop.xlane.xlu0 %1339  ;;  %v1597_v2 = vsel %vm792_vm10, %v1543_v56, %v1596_v61  ;;  %v77_v56 = vld [vmem:[#allocation7 + $0x40] sm:$0xff] }
 0x687   :  { %v1349_v23 = vpop.xlane.xlu1 %1348  ;;  %v1479_v30 = vrot.slane %v1340_v8, %v2312_v47 }
 0x688   :  { %v1493_v57 = vrot.slane %v1349_v23, %v2309_v46 }
 0x689   :  { %v1480_v43 = vsel %vm653_vm8, %v1479_v30, %v1475_v35 }
 0x68a   :  { %v2578_v12 = vpop.xlane.xlu0 %1393  ;;  %v1591_v59 = vsel %vm794_vm11, %v1480_v43, %v1590_v37  ;;  %v76_v37 = vld [vmem:[#allocation7 + $0x38] sm:$0xff] }
 0x68b   :  { %v1355_v13 = vpop.xlane.xlu1 %1354  ;;  %v1560_v3 = vrot.slane %v2578_v12, %v2312_v47  ;;  %v1592_v7 = vsel %vm796_vm12, %v1489_v15, %v1591_v59  ;;  %v1634_v15 = vrot.slane %v2479_v14, %v1633_v58 }
 0x68c   :  { %v1502_v60 = vrot.slane %v1355_v13, %v2309_v46 }
 0x68e   :  { %v1352_v16 = vpop.xlane.xlu0 %1351 }
 0x68f   :  { %v1385_v17 = vpop.xlane.xlu1 %1384  ;;  %v1497_v44 = vrot.slane %v1352_v16, %v2312_v47  ;;  %v1556_v16 = vrot.slane %v2576_v49, %v2309_v46 }
 0x690   :  { %v1547_v54 = vrot.slane %v1385_v17, %v2309_v46 }
 0x691   :  { %v1498_v62 = vsel %vm653_vm8, %v1497_v44, %v1493_v57  ;;  %v1561_v26 = vsel %vm653_vm8, %v1560_v3, %v1556_v16  ;;  %v2026_v57 = vmov 0.0|0.0  }
 0x692   :  { %v1358_v19 = vpop.xlane.xlu0 %1357  ;;  %v1593_v17 = vsel %vm798_vm13, %v1498_v62, %v1592_v7  ;;  %1889 = vmatprep.subr.bf16.mxu0 %v2026_v57  ;;  %v79_v7 = vld [vmem:[#allocation7 + $0x50] sm:$0xff] }
 0x693   :  { %v1397_v21 = vpop.xlane.xlu1 %1396  ;;  %v1506_v50 = vrot.slane %v1358_v19, %v2312_v47 }
 0x694   :  { %v1565_v8 = vrot.slane %v1397_v21, %v2309_v46 }
 0x695   :  { %v1507_v4 = vsel %vm653_vm8, %v1506_v50, %v1502_v60 }
 0x696   :  { %v1388_v25 = vpop.xlane.xlu0 %1387  ;;  %v1594_v21 = vsel %vm800_vm14, %v1507_v4, %v1593_v17 }
 0x697   :  { %v1403_v28 = vpop.xlane.xlu1 %1402  ;;  %v1551_v45 = vrot.slane %v1388_v25, %v2312_v47 }
 0x698   :  { %v1574_v19 = vrot.slane %v1403_v28, %v2309_v46 }
 0x699   :  { %v1552_v63 = vsel %vm653_vm8, %v1551_v45, %v1547_v54  ;;  %v1890_v54 = vpack.c.bf16 %v77_v56, %v76_v37 }
 0x69a   :  { %v1400_v33 = vpop.xlane.xlu0 %1399  ;;  %v1598_v12 = vsel %vm794_vm11, %v1552_v63, %v1597_v2 }
 0x69b   :  { %v1361_v10 = vpop.xlane.xlu1 %1360  ;;  %v1569_v1 = vrot.slane %v1400_v33, %v2312_v47  ;;  %v1599_v30 = vsel %vm796_vm12, %v1561_v26, %v1598_v12  ;;  %v1729_v12 = vsub.s32 6, %v2121_v11 }
 0x69c   :  { %v1511_v23 = vrot.slane %v1361_v10, %v2309_v46 }
 0x69d   :  { %v1570_v24 = vsel %vm653_vm8, %v1569_v1, %v1565_v8 }
 0x69e   :  { %v1406_v52 = vpop.xlane.xlu0 %1405  ;;  %v1600_v51 = vsel %vm798_vm13, %v1570_v24, %v1599_v30 }
 0x69f   :  { %v1578_v5 = vrot.slane %v1406_v52, %v2312_v47  ;;  %v1409_v22 = vpop.xlane.xlu1 %1408 }
 0x6a0   :  { %v1583_v31 = vrot.slane %v1409_v22, %v2309_v46 }
 0x6a1   :  { %v1579_v27 = vsel %vm653_vm8, %v1578_v5, %v1574_v19  ;;  %v1730_v19 = vrot.slane %v2479_v14, %v1729_v12 }
 0x6a2   :  { %v1364_v6 = vpop.xlane.xlu0 %1363  ;;  %v1601_v34 = vsel %vm800_vm14, %v1579_v27, %v1600_v51 }
 0x6a3   :  { %v1515_v13 = vrot.slane %v1364_v6, %v2312_v47  ;;  %v78_v6 = vld [vmem:[#allocation7 + $0x48] sm:$0xff] }
 0x6a4   :  { %v1893_v8 = vpack.c.bf16 %v79_v7, %v78_v6 }
 0x6a5   :  { %v1516_v25 = vsel %vm653_vm8, %v1515_v13, %v1511_v23 }
 0x6a6   :  { %v1412_v29 = vpop.xlane.xlu0 %1411  ;;  %v1595_v49 = vsel %vm802_vm15, %v1516_v25, %v1594_v21 }
 0x6a7   :  { %v1587_v28 = vrot.slane %v1412_v29, %v2312_v47  ;;  %v1605_v32 = vsel %vm67_vm1, %v1595_v49, -1e+30 }
 0x6a8   :  { %v1607_v33 = vsel %vm815_vm2, %v1605_v32, -inf }
 0x6a9   :  { %v1588_v9 = vsel %vm653_vm8, %v1587_v28, %v1583_v31  ;;  %1608 = vmax.xlane.f32.xlu1 %v1607_v33  ;;  %vm2685_vm8 = vmmov 0  }
 0x6aa   :  { %v1602_v35 = vsel %vm802_vm15, %v1588_v9, %v1601_v34 }
 0x6ab   :  { %v1606_v36 = vsel %vm2684_vm9, %v1602_v35, -1e+30 }
 0x6ac   :  { %v1610_v46 = vsel %vm815_vm2, %v1606_v36, -inf }
 0x6ad   :  { %1611 = vmax.xlane.f32.xlu0 %v1610_v46 }
 0x736   :  { %v1609_v47 = vpop.xlane.xlu1 %1608 }
 0x737   :  { %v1613_v20 = vsub.f32 %v1605_v32, %v1609_v47 }
 0x739   :  { %v1615_v38 = vmul.f32 1.442695, %v1613_v20 }
 0x73a   :  { %v1612_v39 = vpop.xlane.xlu0 %1611 }
 0x73b   :  { %1914 = vpow2.f32 %v1615_v38  ;;  %v1614_v18 = vsub.f32 %v1606_v36, %v1612_v39 }
 0x73d   :  { %v1617_v40 = vmul.f32 1.442695, %v1614_v18 }
 0x73f   :  { %1916 = vpow2.f32 %v1617_v40 }
 0x745   :  { %v1915_v42 = vpop.eup %1914 }
 0x746   :  { %v1619_v43 = vsel %vm815_vm2, %v1915_v42, 0.0 }
 0x747   :  { %1620 = vadd.xlane.f32.xlu1 %v1619_v43 }
 0x749   :  { %v1917_v44 = vpop.eup %1916 }
 0x74a   :  { %v1622_v45 = vsel %vm815_vm2, %v1917_v44, 0.0 }
 0x74b   :  { %1623 = vadd.xlane.f32.xlu0 %v1622_v45 }
 0x7d4   :  { %v1621_v53 = vpop.xlane.xlu1 %1620 }
 0x7d5   :  { %1918 = vrcp.f32 %v1621_v53 }
 0x7d8   :  { %v1624_v48 = vpop.xlane.xlu0 %1623 }
 0x7d9   :  { %1920 = vrcp.f32 %v1624_v48 }
 0x7df   :  { %v1919_v41 = vpop.eup %1918 }
 0x7e0   :  { %v1627_v50 = vmul.f32 %v1919_v41, %v1915_v42 }
 0x7e3   :  { %v1921_v55 = vpop.eup %1920 }
 0x7e4   :  { %v1628_v10 = vmul.f32 %v1921_v55, %v1917_v44 }
 0x7e6   :  { %v1629_v52 = vpack.c.bf16 %v1628_v10, %v1627_v50 }
 0x7e8   :  { %1869 = vmatmul.mubr.msk.bf16.vlgmr.msra.gmra.mrb[4].mxu0 %vm815_vm2, %v1629_v52 }
 0x7e9   :  { %1886 = vmatprep.mubr.msk.f32.mxu0 %vm2685_vm8, %v2022_v0  ;;  %1891 = vmatpush3.bf16.msra.mxu0 %v1890_v54  ;;  %v1681_v0 = vld [vmem:[%s2678_s2] sm:$0x3]  ;;  %s2027_s2 = smov [#allocation8]  }
 0x7ea   :  { %1892 = vmatprep.subr.bf16.mxu0 %v2026_v57  ;;  %v1682_v5 = vpack.c.bf16 %v1681_v0, %v1681_v0  ;;  %s1811_s9 = sshll.u32 %s2027_s2, 4  ;;  %s1812_s9 = int_to_ptr.vmem [resolvable:$true] %s1811_s9 }
 0x7eb   :  { %s1989_s10 = scalar_lea.vmem %s1812_s9, 32  ;;  %p1994_p11 = scmp.lt.s32.totalorder %s1812_s9, %s1812_s9 }
 0x7ec   :  { %p1990_p10 = scmp.ne.s32.totalorder %s1812_s9, %s1989_s10  ;;  %p1995_p12 = scmp.lt.s32.totalorder %s1989_s10, %s1989_s10 }
 0x7ed   :  { %1894 = vmatpush3.bf16.msra.mxu0 %v1893_v8 }
 0x7ee   :  { %p1996_p13 = por %p1995_p12, %p1994_p11 }
 0x7f0   :  { %p1997_p0 = pnand %p1996_p13, %p1990_p10 }
 0x8bb   :  { %v1672_v59 = vpop.f32.mrb[4].mxu0 }
 0x8bc   :  { %v1673_v60 = vadd.f32 %v1672_v59, %v1634_v15  ;;  %v1870_v61 = vpop.f32.mrb[5].mxu0 }
 0x8bd   :  { %v1675_v62 = vpop.f32.mrb[6].mxu0 }
 0x8be   :  { %v1676_v63 = vadd.f32 %v1675_v62, %v1634_v15  ;;  %v1871_v1 = vpop.f32.mrb[7].mxu0  ;;  %v1679_v2 = vmax.f32 %v1673_v60, 0.0 }
 0x8c0   :  { %v1680_v3 = vmax.f32 %v1676_v63, 0.0 }
 0x8c2   :  { %v1683_v4 = vpack.c.bf16 %v1680_v3, %v1679_v2 }
 0x8c4   :  { %1873 = vmatpush3.bf16.msra.mxu1 %v1683_v4 }
 0x8c7   :  { %1875 = vmatmul.mubr.msk.bf16.vlgmr.msra.gmra.mrb[8].mxu1 %vm815_vm2, %v1682_v5 }
 0x99a   :  { %v1721_v23 = vpop.f32.mrb[8].mxu1 }
 0x99b   :  { %v1876_v13 = vpop.f32.mrb[9].mxu1  ;;  %1887 = vmatmul.mubr.msk.f32.vlgmr.msra.gmra.mrb[8].mxu0 %vm513_vm4, %v1721_v23 }
 0x99c   :  { %v1724_v16 = vpop.f32.mrb[10].mxu1 }
 0x99d   :  { %v1877_v17 = vpop.f32.mrb[11].mxu1 }
 0xa6e   :  { %v1800_v22 = vpop.f32.mrb[8].mxu0 }
 0xa6f   :  { %v1801_v24 = vadd.f32 %v1800_v22, %v1730_v19  ;;  %v1888_v25 = vpop.f32.mrb[9].mxu0 }
 0xa71   :  { %1804 = vst [vmem:[#allocation8] sm:$0x3] %v1801_v24 }
 0xa72   :  { %2000 = shalt.err (!%p1997_p0)
}
 0xa73   :  { %s2001_s13 = scalar_lea.hbm %s2681_s5, 32 }
 0xa74   :  { %p2002_p1 = scmp.ne.s32.totalorder %s2681_s5, %s2001_s13  ;;  %p2005_p2 = scmp.lt.u32.totalorder %s2001_s13, %s2681_s5 }
 0xa76   :  { %p2007_p3 = pnand %p2005_p2, %p2002_p1 }
 0xa78   :  { %2010 = shalt.err (!%p2007_p3)
}
 0xa79   :  { %1814 = dma.vmem_to_hbm [thread:$0]  %s1812_s9, 32, %s2681_s5, [#allocation4]  }
 0xa7a   :  { %2015 = dma.done.wait [#allocation4], 32  }
 0xa7b   :  { %2016 = vsyncadd [#allocation4], 4294967264 }
 0xa7c   :  { %1818 = vsyncpa [#allocation3], 1 }
 0xa7d   :  { %1819 = vsyncpa [#allocation6], 1 }
 0xa7e   :  { %1820 = vsyncpa [#allocation4], 1 }

</bundles_post_ra>
